<compile_context>
chip_gen: v6e
topology: v6e:2x2x1
jax: 0.10.0
libtpu: 0.0.40
codegen_flags: <defaults>
</compile_context>

<pallas_src>
import functools
import math

import jax
import jax.numpy as jnp
import numpy as np
from jax.experimental import pallas as pl
from jax.experimental.pallas import tpu as pltpu

_LANE = 128
_SUBLANE = 8
_INV_SQRT2 = 1.0 / math.sqrt(2.0)


# ----------------------------- helpers -------------------------------------

def _round_up(n, m):
    return ((n + m - 1) // m) * m


def _batch_tile(b_padded, cap=512):
    """Largest multiple-of-8 tile dividing b_padded (capped), preferring >=2
    grid steps so the second TensorCore on v7x gets work."""
    tb = min(b_padded, cap)
    while b_padded % tb:
        tb -= _SUBLANE
    if tb == b_padded and b_padded >= 2 * _SUBLANE and (b_padded // 2) % _SUBLANE == 0:
        tb = b_padded // 2
    return tb


# ------------------------------ kernel --------------------------------------

def _fused_forward_kernel(x_ref, win_ref, bin_ref, gam_ref, bet_ref,
                          w1_ref, b1_ref, w2_ref, b2_ref, wout_ref, bout_ref,
                          o_ref, *, depth, d_true, eps, cdt):
    # Input linear: operands fed to the MXU in the weight dtype (bf16 or f32),
    # accumulation in f32.
    h = jnp.dot(x_ref[...].astype(cdt), win_ref[...],
                preferred_element_type=jnp.float32) + bin_ref[...]

    inv_d = 1.0 / d_true
    # Static unroll over depth (small).  Weight refs are statically indexed.
    # TODO(synk): for large depth, switch to lax.fori_loop with dynamic ref[d]
    # indexing to bound code size.
    for d in range(depth):
        # LayerNorm over the TRUE feature width.  Padded lanes of h are exactly
        # zero by construction, so full-lane sums equal true-lane sums.
        s1 = jnp.sum(h, axis=-1, keepdims=True)
        s2 = jnp.sum(h * h, axis=-1, keepdims=True)
        mean = s1 * inv_d
        var = s2 * inv_d - mean * mean
        ln = (h - mean) * jax.lax.rsqrt(var + eps) * gam_ref[d] + bet_ref[d]

        a = jnp.dot(ln.astype(cdt), w1_ref[d],
                    preferred_element_type=jnp.float32) + b1_ref[d]
        # Exact (erf) GELU -- matches torch.nn.GELU() default.
        a = 0.5 * a * (1.0 + jax.lax.erf(a * _INV_SQRT2))
        h = h + jnp.dot(a.astype(cdt), w2_ref[d],
                        preferred_element_type=jnp.float32) + b2_ref[d]

    o = jnp.dot(h.astype(cdt), wout_ref[...],
                preferred_element_type=jnp.float32) + bout_ref[...]
    o_ref[...] = o.astype(o_ref.dtype)


# ----------------------- parameters (init / packing) ------------------------

def init_resib_params(key, in_dim, out_dim, hidden_width, hidden_depth,
                      expansion_factor=4):
    """Unpadded f32 params, PyTorch nn.Linear-style init, weights as [in, out]."""
    def lin(k, fi, fo):
        kw, kb = jax.random.split(k)
        bound = 1.0 / math.sqrt(fi)
        w = jax.random.uniform(kw, (fi, fo), jnp.float32, -bound, bound)
        b = jax.random.uniform(kb, (1, fo), jnp.float32, -bound, bound)
        return w, b

    keys = jax.random.split(key, 2 + hidden_depth)
    params = {"in": lin(keys[0], in_dim, hidden_width),
              "out": lin(keys[1], hidden_width, out_dim),
              "blocks": []}
    hexp = hidden_width * expansion_factor
    for d in range(hidden_depth):
        k1, k2 = jax.random.split(keys[2 + d])
        w1, b1 = lin(k1, hidden_width, hexp)
        w2, b2 = lin(k2, hexp, hidden_width)
        gamma = jnp.ones((1, hidden_width), jnp.float32)   # torch LayerNorm default
        beta = jnp.zeros((1, hidden_width), jnp.float32)
        params["blocks"].append((gamma, beta, w1, b1, w2, b2))
    return params


def pack_params(params, param_dtype=jnp.bfloat16):
    """Zero-pad feature dims to multiples of 128, stack blocks along a depth
    axis, and cast matmul weights to param_dtype (biases / LN params stay f32)."""
    win, bin_ = params["in"]
    wout, bout = params["out"]
    blocks = params["blocks"]
    assert len(blocks) >= 1, "fused kernel expects hidden_depth >= 1"

    in_dim, d = win.shape
    hexp = blocks[0][2].shape[1]
    out_dim = wout.shape[1]
    din_p, d_p, h_p, dout_p = (_round_up(v, _LANE)
                               for v in (in_dim, d, hexp, out_dim))

    def pad2(a, r, c):
        return jnp.pad(a, ((0, r - a.shape[0]), (0, c - a.shape[1])))

    packed = {
        "win": pad2(win, din_p, d_p).astype(param_dtype),
        "bin": pad2(bin_, 1, d_p),
        "gam": jnp.stack([pad2(g, 1, d_p) for (g, _, _, _, _, _) in blocks]),
        "bet": jnp.stack([pad2(b, 1, d_p) for (_, b, _, _, _, _) in blocks]),
        "w1": jnp.stack([pad2(w1, d_p, h_p)
                         for (_, _, w1, _, _, _) in blocks]).astype(param_dtype),
        "b1": jnp.stack([pad2(b1, 1, h_p) for (_, _, _, b1, _, _) in blocks]),
        "w2": jnp.stack([pad2(w2, h_p, d_p)
                         for (_, _, _, _, w2, _) in blocks]).astype(param_dtype),
        "b2": jnp.stack([pad2(b2, 1, d_p) for (_, _, _, _, _, b2) in blocks]),
        "wout": pad2(wout, d_p, dout_p).astype(param_dtype),
        "bout": pad2(bout, 1, dout_p),
    }
    meta = dict(in_dim=in_dim, out_dim=out_dim, hidden_width=d,
                depth=len(blocks), din_p=din_p, d_p=d_p, h_p=h_p,
                dout_p=dout_p, param_dtype=param_dtype)
    return packed, meta


# ------------------------------ forward -------------------------------------

_CONST_ORDER = ("win", "bin", "gam", "bet", "w1", "b1", "w2", "b2", "wout", "bout")


def _build_and_run(packed, meta, xp, tb, *, single_buffer_weights):
    b_p, din_p = xp.shape
    depth, d_p, h_p, dout_p = meta["depth"], meta["d_p"], meta["h_p"], meta["dout_p"]
    grid = (b_p // tb,)

    consts = [packed[k] for k in _CONST_ORDER]
    const_bytes = sum(int(a.size) * a.dtype.itemsize for a in consts)
    if const_bytes > 44 * 1024 * 1024:
        # TODO(synk): for very wide models, tile the expansion dim H over an
        # extra grid axis instead of keeping all stacked weights VMEM-resident.
        raise ValueError("stacked weights too large to keep VMEM-resident: "
                         f"{const_bytes / 2**20:.1f} MiB")

    def const_spec(shape):
        idx = lambda i: (0,) * len(shape)
        if single_buffer_weights:
            # Grid-constant blocks: a single VMEM buffer is enough.
            return pl.BlockSpec(shape, idx, pipeline_mode=pl.Buffered(1))
        return pl.BlockSpec(shape, idx)

    in_specs = [pl.BlockSpec((tb, din_p), lambda i: (i, 0))]
    in_specs += [const_spec(a.shape) for a in consts]
    out_specs = pl.BlockSpec((tb, dout_p), lambda i: (i, 0))

    # Explicit VMEM budget: worst case 2 buffers per constant block + I/O tiles
    # + in-kernel intermediates, with headroom; clamped to a sane range.
    act_bytes = 2 * tb * (din_p + dout_p) * 4
    work_bytes = 8 * tb * (d_p + h_p) * 4
    vmem_need = 2 * const_bytes + act_bytes + work_bytes
    vmem_limit = int(min(max(2 * vmem_need, 32 * 1024 * 1024),
                         120 * 1024 * 1024))

    cost = pl.CostEstimate(
        flops=2 * b_p * (din_p * d_p + depth * 2 * d_p * h_p + d_p * dout_p),
        transcendentals=b_p * depth * h_p,          # erf in the GELU
        bytes_accessed=int(xp.size * 4 + b_p * dout_p * 4 + const_bytes),
    )

    kernel = functools.partial(
        _fused_forward_kernel, depth=depth, d_true=meta["hidden_width"],
        eps=1e-5, cdt=meta["param_dtype"])

    return pl.pallas_call(
        kernel,
        out_shape=jax.ShapeDtypeStruct((b_p, dout_p), jnp.float32),
        grid_spec=pltpu.PrefetchScalarGridSpec(
            num_scalar_prefetch=0,
            grid=grid,
            in_specs=in_specs,
            out_specs=out_specs,
        ),
        compiler_params=pltpu.CompilerParams(
            dimension_semantics=("parallel",),
            vmem_limit_bytes=vmem_limit),
        cost_estimate=cost,
    )(xp, *consts)


def resib_forward(packed, meta, x):
    """Fused ResIBModel forward. x: [B, in_dim] f32 -> [B, out_dim] f32."""
    b, in_dim = x.shape
    assert in_dim == meta["in_dim"]
    b_p = _round_up(b, _SUBLANE)
    xp = jnp.pad(x.astype(jnp.float32),
                 ((0, b_p - b), (0, meta["din_p"] - in_dim)))
    tb = _batch_tile(b_p)
    try:
        out_p = jax.block_until_ready(
            _build_and_run(packed, meta, xp, tb, single_buffer_weights=True))
    except Exception:
        # pipeline_mode=pl.Buffered(1) not supported by this build; fall back
        # to default double-buffered (grid-constant) weight blocks.
        out_p = jax.block_until_ready(
            _build_and_run(packed, meta, xp, tb, single_buffer_weights=False))
    return out_p[:b, :meta["out_dim"]]


# ----------------------------- reference ------------------------------------

def _ref_forward(params, x):
    def gelu(z):
        return 0.5 * z * (1.0 + jax.lax.erf(z * _INV_SQRT2))

    win, bi = params["in"]
    h = x @ win + bi
    for (g, be, w1, b1, w2, b2) in params["blocks"]:
        mean = jnp.mean(h, axis=-1, keepdims=True)
        var = jnp.mean((h - mean) ** 2, axis=-1, keepdims=True)
        ln = (h - mean) * jax.lax.rsqrt(var + 1e-5) * g + be
        h = h + (gelu(ln @ w1 + b1) @ w2 + b2)
    wout, bo = params["out"]
    return h @ wout + bo


# -------------------------------- main ---------------------------------------

if __name__ == "__main__":
    key = jax.random.PRNGKey(0)
    k_param, k_x = jax.random.split(key)

    batch = 30                 # deliberately not a multiple of 8 (exercises padding)
    in_dim = 16
    hidden_width = 32
    hidden_depth = 2
    expansion_factor = 4
    out_dim = 8

    params = init_resib_params(k_param, in_dim, out_dim, hidden_width,
                               hidden_depth, expansion_factor)
    x = jax.random.normal(k_x, (batch, in_dim), jnp.float32)
    ref = jax.block_until_ready(_ref_forward(params, x))

    # f32 weights: numerically faithful to the PyTorch module.
    packed32, meta32 = pack_params(params, param_dtype=jnp.float32)
    out32 = jax.block_until_ready(resib_forward(packed32, meta32, x))
    np.testing.assert_allclose(np.asarray(out32), np.asarray(ref),
                               rtol=1e-4, atol=1e-4)

    # bf16 weights on the MXU with f32 accumulation (recommended deployment
    # dtype per the perf review) — relaxed tolerance for reduced precision.
    packed16, meta16 = pack_params(params, param_dtype=jnp.bfloat16)
    out16 = jax.block_until_ready(resib_forward(packed16, meta16, x))
    np.testing.assert_allclose(np.asarray(out16), np.asarray(ref),
                               rtol=5e-2, atol=5e-2)

    print("KERNEL_OK")
</pallas_src>

<mosaic_0001>
module attributes {stable_mosaic.version = 11 : i64} {
  func.func @_fused_forward_kernel(%arg0: i32, %arg1: memref<16x128xf32, #tpu.memory_space<vmem>>, %arg2: memref<128x128xf32, #tpu.memory_space<vmem>>, %arg3: memref<1x128xf32, #tpu.memory_space<vmem>>, %arg4: memref<2x1x128xf32, #tpu.memory_space<vmem>>, %arg5: memref<2x1x128xf32, #tpu.memory_space<vmem>>, %arg6: memref<2x128x128xf32, #tpu.memory_space<vmem>>, %arg7: memref<2x1x128xf32, #tpu.memory_space<vmem>>, %arg8: memref<2x128x128xf32, #tpu.memory_space<vmem>>, %arg9: memref<2x1x128xf32, #tpu.memory_space<vmem>>, %arg10: memref<128x128xf32, #tpu.memory_space<vmem>>, %arg11: memref<1x128xf32, #tpu.memory_space<vmem>>, %arg12: memref<16x128xf32, #tpu.memory_space<vmem>>) attributes {dimension_semantics = [#tpu.dimension_semantics<parallel>], iteration_bounds = array<i64: 2>, scalar_prefetch = 0 : i64, scratch_operands = 0 : i64, tpu.core_type = #tpu.core_type<tc>, window_params = [{transform_indices = @transform_0, window_bounds = array<i64: 16, 128>}, {pipeline_mode = #tpu.pipeline_mode<synchronous>, transform_indices = @transform_1, window_bounds = array<i64: 128, 128>}, {pipeline_mode = #tpu.pipeline_mode<synchronous>, transform_indices = @transform_2, window_bounds = array<i64: 1, 128>}, {pipeline_mode = #tpu.pipeline_mode<synchronous>, transform_indices = @transform_3, window_bounds = array<i64: 2, 1, 128>}, {pipeline_mode = #tpu.pipeline_mode<synchronous>, transform_indices = @transform_4, window_bounds = array<i64: 2, 1, 128>}, {pipeline_mode = #tpu.pipeline_mode<synchronous>, transform_indices = @transform_5, window_bounds = array<i64: 2, 128, 128>}, {pipeline_mode = #tpu.pipeline_mode<synchronous>, transform_indices = @transform_6, window_bounds = array<i64: 2, 1, 128>}, {pipeline_mode = #tpu.pipeline_mode<synchronous>, transform_indices = @transform_7, window_bounds = array<i64: 2, 128, 128>}, {pipeline_mode = #tpu.pipeline_mode<synchronous>, transform_indices = @transform_8, window_bounds = array<i64: 2, 1, 128>}, {pipeline_mode = #tpu.pipeline_mode<synchronous>, transform_indices = @transform_9, window_bounds = array<i64: 128, 128>}, {pipeline_mode = #tpu.pipeline_mode<synchronous>, transform_indices = @transform_10, window_bounds = array<i64: 1, 128>}, {transform_indices = @transform_11, window_bounds = array<i64: 16, 128>}]} {
    %c0 = arith.constant 0 : index
    %c0_0 = arith.constant 0 : index
    %0 = vector.load %arg1[%c0, %c0_0] : memref<16x128xf32, #tpu.memory_space<vmem>>, vector<16x128xf32>
    %c0_1 = arith.constant 0 : index
    %c0_2 = arith.constant 0 : index
    %1 = vector.load %arg2[%c0_1, %c0_2] : memref<128x128xf32, #tpu.memory_space<vmem>>, vector<128x128xf32>
    %cst = arith.constant dense<0.000000e+00> : vector<16x128xf32>
    %2 = tpu.matmul %0, %1, %cst {dimension_numbers = #tpu.dot_dimension_numbers<[1], [0], [0], [1], [0, 0, 1, 1], [], []>} : vector<16x128xf32>, vector<128x128xf32>, vector<16x128xf32> -> vector<16x128xf32>
    %c0_3 = arith.constant 0 : index
    %c0_4 = arith.constant 0 : index
    %3 = vector.load %arg3[%c0_3, %c0_4] : memref<1x128xf32, #tpu.memory_space<vmem>>, vector<1x128xf32>
    %4 = vector.broadcast %3 : vector<1x128xf32> to vector<16x128xf32>
    %5 = arith.addf %2, %4 : vector<16x128xf32>
    %cst_5 = arith.constant dense<0.000000e+00> : vector<16xf32>
    %6 = vector.multi_reduction <add>, %5, %cst_5 [1] : vector<16x128xf32> to vector<16xf32>
    %7 = vector.shape_cast %6 : vector<16xf32> to vector<16x1xf32>
    %8 = arith.mulf %5, %5 : vector<16x128xf32>
    %cst_6 = arith.constant dense<0.000000e+00> : vector<16xf32>
    %9 = vector.multi_reduction <add>, %8, %cst_6 [1] : vector<16x128xf32> to vector<16xf32>
    %10 = vector.shape_cast %9 : vector<16xf32> to vector<16x1xf32>
    %cst_7 = arith.constant 3.125000e-02 : f32
    %11 = vector.broadcast %cst_7 : f32 to vector<16x1xf32>
    %12 = arith.mulf %7, %11 : vector<16x1xf32>
    %cst_8 = arith.constant 3.125000e-02 : f32
    %13 = vector.broadcast %cst_8 : f32 to vector<16x1xf32>
    %14 = arith.mulf %10, %13 : vector<16x1xf32>
    %15 = arith.mulf %12, %12 : vector<16x1xf32>
    %16 = arith.subf %14, %15 : vector<16x1xf32>
    %17 = vector.broadcast %12 : vector<16x1xf32> to vector<16x128xf32>
    %18 = arith.subf %5, %17 : vector<16x128xf32>
    %cst_9 = arith.constant 9.99999974E-6 : f32
    %19 = vector.broadcast %cst_9 : f32 to vector<16x1xf32>
    %20 = arith.addf %16, %19 : vector<16x1xf32>
    %21 = math.rsqrt %20 : vector<16x1xf32>
    %22 = vector.broadcast %21 : vector<16x1xf32> to vector<16x128xf32>
    %23 = arith.mulf %18, %22 : vector<16x128xf32>
    %c0_10 = arith.constant 0 : index
    %c0_11 = arith.constant 0 : index
    %c0_12 = arith.constant 0 : index
    %24 = vector.load %arg4[%c0_10, %c0_11, %c0_12] : memref<2x1x128xf32, #tpu.memory_space<vmem>>, vector<1x1x128xf32>
    %25 = vector.shape_cast %24 : vector<1x1x128xf32> to vector<1x128xf32>
    %26 = vector.broadcast %25 : vector<1x128xf32> to vector<16x128xf32>
    %27 = arith.mulf %23, %26 : vector<16x128xf32>
    %c0_13 = arith.constant 0 : index
    %c0_14 = arith.constant 0 : index
    %c0_15 = arith.constant 0 : index
    %28 = vector.load %arg5[%c0_13, %c0_14, %c0_15] : memref<2x1x128xf32, #tpu.memory_space<vmem>>, vector<1x1x128xf32>
    %29 = vector.shape_cast %28 : vector<1x1x128xf32> to vector<1x128xf32>
    %30 = vector.broadcast %29 : vector<1x128xf32> to vector<16x128xf32>
    %31 = arith.addf %27, %30 : vector<16x128xf32>
    %c0_16 = arith.constant 0 : index
    %c0_17 = arith.constant 0 : index
    %c0_18 = arith.constant 0 : index
    %32 = vector.load %arg6[%c0_16, %c0_17, %c0_18] : memref<2x128x128xf32, #tpu.memory_space<vmem>>, vector<1x128x128xf32>
    %33 = vector.shape_cast %32 : vector<1x128x128xf32> to vector<128x128xf32>
    %cst_19 = arith.constant dense<0.000000e+00> : vector<16x128xf32>
    %34 = tpu.matmul %31, %33, %cst_19 {dimension_numbers = #tpu.dot_dimension_numbers<[1], [0], [0], [1], [0, 0, 1, 1], [], []>} : vector<16x128xf32>, vector<128x128xf32>, vector<16x128xf32> -> vector<16x128xf32>
    %c0_20 = arith.constant 0 : index
    %c0_21 = arith.constant 0 : index
    %c0_22 = arith.constant 0 : index
    %35 = vector.load %arg7[%c0_20, %c0_21, %c0_22] : memref<2x1x128xf32, #tpu.memory_space<vmem>>, vector<1x1x128xf32>
    %36 = vector.shape_cast %35 : vector<1x1x128xf32> to vector<1x128xf32>
    %37 = vector.broadcast %36 : vector<1x128xf32> to vector<16x128xf32>
    %38 = arith.addf %34, %37 : vector<16x128xf32>
    %cst_23 = arith.constant 5.000000e-01 : f32
    %39 = vector.broadcast %cst_23 : f32 to vector<16x128xf32>
    %40 = arith.mulf %39, %38 : vector<16x128xf32>
    %cst_24 = arith.constant 0.707106769 : f32
    %41 = vector.broadcast %cst_24 : f32 to vector<16x128xf32>
    %42 = arith.mulf %38, %41 : vector<16x128xf32>
    %43 = math.erf %42 : vector<16x128xf32>
    %cst_25 = arith.constant 1.000000e+00 : f32
    %44 = vector.broadcast %cst_25 : f32 to vector<16x128xf32>
    %45 = arith.addf %44, %43 : vector<16x128xf32>
    %46 = arith.mulf %40, %45 : vector<16x128xf32>
    %c0_26 = arith.constant 0 : index
    %c0_27 = arith.constant 0 : index
    %c0_28 = arith.constant 0 : index
    %47 = vector.load %arg8[%c0_26, %c0_27, %c0_28] : memref<2x128x128xf32, #tpu.memory_space<vmem>>, vector<1x128x128xf32>
    %48 = vector.shape_cast %47 : vector<1x128x128xf32> to vector<128x128xf32>
    %cst_29 = arith.constant dense<0.000000e+00> : vector<16x128xf32>
    %49 = tpu.matmul %46, %48, %cst_29 {dimension_numbers = #tpu.dot_dimension_numbers<[1], [0], [0], [1], [0, 0, 1, 1], [], []>} : vector<16x128xf32>, vector<128x128xf32>, vector<16x128xf32> -> vector<16x128xf32>
    %50 = arith.addf %5, %49 : vector<16x128xf32>
    %c0_30 = arith.constant 0 : index
    %c0_31 = arith.constant 0 : index
    %c0_32 = arith.constant 0 : index
    %51 = vector.load %arg9[%c0_30, %c0_31, %c0_32] : memref<2x1x128xf32, #tpu.memory_space<vmem>>, vector<1x1x128xf32>
    %52 = vector.shape_cast %51 : vector<1x1x128xf32> to vector<1x128xf32>
    %53 = vector.broadcast %52 : vector<1x128xf32> to vector<16x128xf32>
    %54 = arith.addf %50, %53 : vector<16x128xf32>
    %cst_33 = arith.constant dense<0.000000e+00> : vector<16xf32>
    %55 = vector.multi_reduction <add>, %54, %cst_33 [1] : vector<16x128xf32> to vector<16xf32>
    %56 = vector.shape_cast %55 : vector<16xf32> to vector<16x1xf32>
    %57 = arith.mulf %54, %54 : vector<16x128xf32>
    %cst_34 = arith.constant dense<0.000000e+00> : vector<16xf32>
    %58 = vector.multi_reduction <add>, %57, %cst_34 [1] : vector<16x128xf32> to vector<16xf32>
    %59 = vector.shape_cast %58 : vector<16xf32> to vector<16x1xf32>
    %cst_35 = arith.constant 3.125000e-02 : f32
    %60 = vector.broadcast %cst_35 : f32 to vector<16x1xf32>
    %61 = arith.mulf %56, %60 : vector<16x1xf32>
    %cst_36 = arith.constant 3.125000e-02 : f32
    %62 = vector.broadcast %cst_36 : f32 to vector<16x1xf32>
    %63 = arith.mulf %59, %62 : vector<16x1xf32>
    %64 = arith.mulf %61, %61 : vector<16x1xf32>
    %65 = arith.subf %63, %64 : vector<16x1xf32>
    %66 = vector.broadcast %61 : vector<16x1xf32> to vector<16x128xf32>
    %67 = arith.subf %54, %66 : vector<16x128xf32>
    %cst_37 = arith.constant 9.99999974E-6 : f32
    %68 = vector.broadcast %cst_37 : f32 to vector<16x1xf32>
    %69 = arith.addf %65, %68 : vector<16x1xf32>
    %70 = math.rsqrt %69 : vector<16x1xf32>
    %71 = vector.broadcast %70 : vector<16x1xf32> to vector<16x128xf32>
    %72 = arith.mulf %67, %71 : vector<16x128xf32>
    %c1 = arith.constant 1 : index
    %c0_38 = arith.constant 0 : index
    %c0_39 = arith.constant 0 : index
    %73 = vector.load %arg4[%c1, %c0_38, %c0_39] : memref<2x1x128xf32, #tpu.memory_space<vmem>>, vector<1x1x128xf32>
    %74 = vector.shape_cast %73 : vector<1x1x128xf32> to vector<1x128xf32>
    %75 = vector.broadcast %74 : vector<1x128xf32> to vector<16x128xf32>
    %76 = arith.mulf %72, %75 : vector<16x128xf32>
    %c1_40 = arith.constant 1 : index
    %c0_41 = arith.constant 0 : index
    %c0_42 = arith.constant 0 : index
    %77 = vector.load %arg5[%c1_40, %c0_41, %c0_42] : memref<2x1x128xf32, #tpu.memory_space<vmem>>, vector<1x1x128xf32>
    %78 = vector.shape_cast %77 : vector<1x1x128xf32> to vector<1x128xf32>
    %79 = vector.broadcast %78 : vector<1x128xf32> to vector<16x128xf32>
    %80 = arith.addf %76, %79 : vector<16x128xf32>
    %c1_43 = arith.constant 1 : index
    %c0_44 = arith.constant 0 : index
    %c0_45 = arith.constant 0 : index
    %81 = vector.load %arg6[%c1_43, %c0_44, %c0_45] : memref<2x128x128xf32, #tpu.memory_space<vmem>>, vector<1x128x128xf32>
    %82 = vector.shape_cast %81 : vector<1x128x128xf32> to vector<128x128xf32>
    %cst_46 = arith.constant dense<0.000000e+00> : vector<16x128xf32>
    %83 = tpu.matmul %80, %82, %cst_46 {dimension_numbers = #tpu.dot_dimension_numbers<[1], [0], [0], [1], [0, 0, 1, 1], [], []>} : vector<16x128xf32>, vector<128x128xf32>, vector<16x128xf32> -> vector<16x128xf32>
    %c1_47 = arith.constant 1 : index
    %c0_48 = arith.constant 0 : index
    %c0_49 = arith.constant 0 : index
    %84 = vector.load %arg7[%c1_47, %c0_48, %c0_49] : memref<2x1x128xf32, #tpu.memory_space<vmem>>, vector<1x1x128xf32>
    %85 = vector.shape_cast %84 : vector<1x1x128xf32> to vector<1x128xf32>
    %86 = vector.broadcast %85 : vector<1x128xf32> to vector<16x128xf32>
    %87 = arith.addf %83, %86 : vector<16x128xf32>
    %cst_50 = arith.constant 5.000000e-01 : f32
    %88 = vector.broadcast %cst_50 : f32 to vector<16x128xf32>
    %89 = arith.mulf %88, %87 : vector<16x128xf32>
    %cst_51 = arith.constant 0.707106769 : f32
    %90 = vector.broadcast %cst_51 : f32 to vector<16x128xf32>
    %91 = arith.mulf %87, %90 : vector<16x128xf32>
    %92 = math.erf %91 : vector<16x128xf32>
    %cst_52 = arith.constant 1.000000e+00 : f32
    %93 = vector.broadcast %cst_52 : f32 to vector<16x128xf32>
    %94 = arith.addf %93, %92 : vector<16x128xf32>
    %95 = arith.mulf %89, %94 : vector<16x128xf32>
    %c1_53 = arith.constant 1 : index
    %c0_54 = arith.constant 0 : index
    %c0_55 = arith.constant 0 : index
    %96 = vector.load %arg8[%c1_53, %c0_54, %c0_55] : memref<2x128x128xf32, #tpu.memory_space<vmem>>, vector<1x128x128xf32>
    %97 = vector.shape_cast %96 : vector<1x128x128xf32> to vector<128x128xf32>
    %cst_56 = arith.constant dense<0.000000e+00> : vector<16x128xf32>
    %98 = tpu.matmul %95, %97, %cst_56 {dimension_numbers = #tpu.dot_dimension_numbers<[1], [0], [0], [1], [0, 0, 1, 1], [], []>} : vector<16x128xf32>, vector<128x128xf32>, vector<16x128xf32> -> vector<16x128xf32>
    %99 = arith.addf %54, %98 : vector<16x128xf32>
    %c1_57 = arith.constant 1 : index
    %c0_58 = arith.constant 0 : index
    %c0_59 = arith.constant 0 : index
    %100 = vector.load %arg9[%c1_57, %c0_58, %c0_59] : memref<2x1x128xf32, #tpu.memory_space<vmem>>, vector<1x1x128xf32>
    %101 = vector.shape_cast %100 : vector<1x1x128xf32> to vector<1x128xf32>
    %102 = vector.broadcast %101 : vector<1x128xf32> to vector<16x128xf32>
    %103 = arith.addf %99, %102 : vector<16x128xf32>
    %c0_60 = arith.constant 0 : index
    %c0_61 = arith.constant 0 : index
    %104 = vector.load %arg10[%c0_60, %c0_61] : memref<128x128xf32, #tpu.memory_space<vmem>>, vector<128x128xf32>
    %cst_62 = arith.constant dense<0.000000e+00> : vector<16x128xf32>
    %105 = tpu.matmul %103, %104, %cst_62 {dimension_numbers = #tpu.dot_dimension_numbers<[1], [0], [0], [1], [0, 0, 1, 1], [], []>} : vector<16x128xf32>, vector<128x128xf32>, vector<16x128xf32> -> vector<16x128xf32>
    %c0_63 = arith.constant 0 : index
    %c0_64 = arith.constant 0 : index
    %106 = vector.load %arg11[%c0_63, %c0_64] : memref<1x128xf32, #tpu.memory_space<vmem>>, vector<1x128xf32>
    %107 = vector.broadcast %106 : vector<1x128xf32> to vector<16x128xf32>
    %108 = arith.addf %105, %107 : vector<16x128xf32>
    %c0_65 = arith.constant 0 : index
    %c0_66 = arith.constant 0 : index
    %109 = vector.load %arg12[%c0_65, %c0_66] : memref<16x128xf32, #tpu.memory_space<vmem>>, vector<16x128xf32>
    tpu.vector_store %arg12[%c0_65, %c0_66], %108 {strides = array<i32>} : memref<16x128xf32, #tpu.memory_space<vmem>>, vector<16x128xf32>,
    return
  }
  func.func @transform_0(%arg0: i32) -> (i32, i32) {
    %c0_i32 = arith.constant 0 : i32
    %c0_i32_0 = arith.constant 0 : i32
    return %arg0, %c0_i32 : i32, i32
  }
  func.func @transform_1(%arg0: i32) -> (i32, i32) {
    %c0_i32 = arith.constant 0 : i32
    %c0_i32_0 = arith.constant 0 : i32
    %c0_i32_1 = arith.constant 0 : i32
    return %c0_i32, %c0_i32_0 : i32, i32
  }
  func.func @transform_2(%arg0: i32) -> (i32, i32) {
    %c0_i32 = arith.constant 0 : i32
    %c0_i32_0 = arith.constant 0 : i32
    %c0_i32_1 = arith.constant 0 : i32
    return %c0_i32, %c0_i32_0 : i32, i32
  }
  func.func @transform_3(%arg0: i32) -> (i32, i32, i32) {
    %c0_i32 = arith.constant 0 : i32
    %c0_i32_0 = arith.constant 0 : i32
    %c0_i32_1 = arith.constant 0 : i32
    %c0_i32_2 = arith.constant 0 : i32
    return %c0_i32, %c0_i32_0, %c0_i32_1 : i32, i32, i32
  }
  func.func @transform_4(%arg0: i32) -> (i32, i32, i32) {
    %c0_i32 = arith.constant 0 : i32
    %c0_i32_0 = arith.constant 0 : i32
    %c0_i32_1 = arith.constant 0 : i32
    %c0_i32_2 = arith.constant 0 : i32
    return %c0_i32, %c0_i32_0, %c0_i32_1 : i32, i32, i32
  }
  func.func @transform_5(%arg0: i32) -> (i32, i32, i32) {
    %c0_i32 = arith.constant 0 : i32
    %c0_i32_0 = arith.constant 0 : i32
    %c0_i32_1 = arith.constant 0 : i32
    %c0_i32_2 = arith.constant 0 : i32
    return %c0_i32, %c0_i32_0, %c0_i32_1 : i32, i32, i32
  }
  func.func @transform_6(%arg0: i32) -> (i32, i32, i32) {
    %c0_i32 = arith.constant 0 : i32
    %c0_i32_0 = arith.constant 0 : i32
    %c0_i32_1 = arith.constant 0 : i32
    %c0_i32_2 = arith.constant 0 : i32
    return %c0_i32, %c0_i32_0, %c0_i32_1 : i32, i32, i32
  }
  func.func @transform_7(%arg0: i32) -> (i32, i32, i32) {
    %c0_i32 = arith.constant 0 : i32
    %c0_i32_0 = arith.constant 0 : i32
    %c0_i32_1 = arith.constant 0 : i32
    %c0_i32_2 = arith.constant 0 : i32
    return %c0_i32, %c0_i32_0, %c0_i32_1 : i32, i32, i32
  }
  func.func @transform_8(%arg0: i32) -> (i32, i32, i32) {
    %c0_i32 = arith.constant 0 : i32
    %c0_i32_0 = arith.constant 0 : i32
    %c0_i32_1 = arith.constant 0 : i32
    %c0_i32_2 = arith.constant 0 : i32
    return %c0_i32, %c0_i32_0, %c0_i32_1 : i32, i32, i32
  }
  func.func @transform_9(%arg0: i32) -> (i32, i32) {
    %c0_i32 = arith.constant 0 : i32
    %c0_i32_0 = arith.constant 0 : i32
    %c0_i32_1 = arith.constant 0 : i32
    return %c0_i32, %c0_i32_0 : i32, i32
  }
  func.func @transform_10(%arg0: i32) -> (i32, i32) {
    %c0_i32 = arith.constant 0 : i32
    %c0_i32_0 = arith.constant 0 : i32
    %c0_i32_1 = arith.constant 0 : i32
    return %c0_i32, %c0_i32_0 : i32, i32
  }
  func.func @transform_11(%arg0: i32) -> (i32, i32) {
    %c0_i32 = arith.constant 0 : i32
    %c0_i32_0 = arith.constant 0 : i32
    return %arg0, %c0_i32 : i32, i32
  }
}

module attributes {stable_mosaic.version = 11 : i64} {
  func.func @_fused_forward_kernel(%arg0: i32, %arg1: memref<16x128xf32, #tpu.memory_space<vmem>>, %arg2: memref<128x128xf32, #tpu.memory_space<vmem>>, %arg3: memref<1x128xf32, #tpu.memory_space<vmem>>, %arg4: memref<2x1x128xf32, #tpu.memory_space<vmem>>, %arg5: memref<2x1x128xf32, #tpu.memory_space<vmem>>, %arg6: memref<2x128x128xf32, #tpu.memory_space<vmem>>, %arg7: memref<2x1x128xf32, #tpu.memory_space<vmem>>, %arg8: memref<2x128x128xf32, #tpu.memory_space<vmem>>, %arg9: memref<2x1x128xf32, #tpu.memory_space<vmem>>, %arg10: memref<128x128xf32, #tpu.memory_space<vmem>>, %arg11: memref<1x128xf32, #tpu.memory_space<vmem>>, %arg12: memref<16x128xf32, #tpu.memory_space<vmem>>) attributes {dimension_semantics = [#tpu.dimension_semantics<parallel>], iteration_bounds = array<i64: 2>, scalar_prefetch = 0 : i64, scratch_operands = 0 : i64, tpu.core_type = #tpu.core_type<tc>, window_params = [{transform_indices = @transform_0, window_bounds = array<i64: 16, 128>}, {pipeline_mode = #tpu.pipeline_mode<synchronous>, transform_indices = @transform_1, window_bounds = array<i64: 128, 128>}, {pipeline_mode = #tpu.pipeline_mode<synchronous>, transform_indices = @transform_2, window_bounds = array<i64: 1, 128>}, {pipeline_mode = #tpu.pipeline_mode<synchronous>, transform_indices = @transform_3, window_bounds = array<i64: 2, 1, 128>}, {pipeline_mode = #tpu.pipeline_mode<synchronous>, transform_indices = @transform_4, window_bounds = array<i64: 2, 1, 128>}, {pipeline_mode = #tpu.pipeline_mode<synchronous>, transform_indices = @transform_5, window_bounds = array<i64: 2, 128, 128>}, {pipeline_mode = #tpu.pipeline_mode<synchronous>, transform_indices = @transform_6, window_bounds = array<i64: 2, 1, 128>}, {pipeline_mode = #tpu.pipeline_mode<synchronous>, transform_indices = @transform_7, window_bounds = array<i64: 2, 128, 128>}, {pipeline_mode = #tpu.pipeline_mode<synchronous>, transform_indices = @transform_8, window_bounds = array<i64: 2, 1, 128>}, {pipeline_mode = #tpu.pipeline_mode<synchronous>, transform_indices = @transform_9, window_bounds = array<i64: 128, 128>}, {pipeline_mode = #tpu.pipeline_mode<synchronous>, transform_indices = @transform_10, window_bounds = array<i64: 1, 128>}, {transform_indices = @transform_11, window_bounds = array<i64: 16, 128>}]} {
    %c0 = arith.constant 0 : index
    %c0_0 = arith.constant 0 : index
    %0 = vector.load %arg1[%c0, %c0_0] : memref<16x128xf32, #tpu.memory_space<vmem>>, vector<16x128xf32>
    %c0_1 = arith.constant 0 : index
    %c0_2 = arith.constant 0 : index
    %1 = vector.load %arg2[%c0_1, %c0_2] : memref<128x128xf32, #tpu.memory_space<vmem>>, vector<128x128xf32>
    %cst = arith.constant dense<0.000000e+00> : vector<16x128xf32>
    %2 = tpu.matmul %0, %1, %cst {dimension_numbers = #tpu.dot_dimension_numbers<[1], [0], [0], [1], [0, 0, 1, 1], [], []>} : vector<16x128xf32>, vector<128x128xf32>, vector<16x128xf32> -> vector<16x128xf32>
    %c0_3 = arith.constant 0 : index
    %c0_4 = arith.constant 0 : index
    %3 = vector.load %arg3[%c0_3, %c0_4] : memref<1x128xf32, #tpu.memory_space<vmem>>, vector<1x128xf32>
    %4 = vector.broadcast %3 : vector<1x128xf32> to vector<16x128xf32>
    %5 = arith.addf %2, %4 : vector<16x128xf32>
    %cst_5 = arith.constant dense<0.000000e+00> : vector<16xf32>
    %6 = vector.multi_reduction <add>, %5, %cst_5 [1] : vector<16x128xf32> to vector<16xf32>
    %7 = vector.shape_cast %6 : vector<16xf32> to vector<16x1xf32>
    %8 = arith.mulf %5, %5 : vector<16x128xf32>
    %cst_6 = arith.constant dense<0.000000e+00> : vector<16xf32>
    %9 = vector.multi_reduction <add>, %8, %cst_6 [1] : vector<16x128xf32> to vector<16xf32>
    %10 = vector.shape_cast %9 : vector<16xf32> to vector<16x1xf32>
    %cst_7 = arith.constant 3.125000e-02 : f32
    %11 = vector.broadcast %cst_7 : f32 to vector<16x1xf32>
    %12 = arith.mulf %7, %11 : vector<16x1xf32>
    %cst_8 = arith.constant 3.125000e-02 : f32
    %13 = vector.broadcast %cst_8 : f32 to vector<16x1xf32>
    %14 = arith.mulf %10, %13 : vector<16x1xf32>
    %15 = arith.mulf %12, %12 : vector<16x1xf32>
    %16 = arith.subf %14, %15 : vector<16x1xf32>
    %17 = vector.broadcast %12 : vector<16x1xf32> to vector<16x128xf32>
    %18 = arith.subf %5, %17 : vector<16x128xf32>
    %cst_9 = arith.constant 9.99999974E-6 : f32
    %19 = vector.broadcast %cst_9 : f32 to vector<16x1xf32>
    %20 = arith.addf %16, %19 : vector<16x1xf32>
    %21 = math.rsqrt %20 : vector<16x1xf32>
    %22 = vector.broadcast %21 : vector<16x1xf32> to vector<16x128xf32>
    %23 = arith.mulf %18, %22 : vector<16x128xf32>
    %c0_10 = arith.constant 0 : index
    %c0_11 = arith.constant 0 : index
    %c0_12 = arith.constant 0 : index
    %24 = vector.load %arg4[%c0_10, %c0_11, %c0_12] : memref<2x1x128xf32, #tpu.memory_space<vmem>>, vector<1x1x128xf32>
    %25 = vector.shape_cast %24 : vector<1x1x128xf32> to vector<1x128xf32>
    %26 = vector.broadcast %25 : vector<1x128xf32> to vector<16x128xf32>
    %27 = arith.mulf %23, %26 : vector<16x128xf32>
    %c0_13 = arith.constant 0 : index
    %c0_14 = arith.constant 0 : index
    %c0_15 = arith.constant 0 : index
    %28 = vector.load %arg5[%c0_13, %c0_14, %c0_15] : memref<2x1x128xf32, #tpu.memory_space<vmem>>, vector<1x1x128xf32>
    %29 = vector.shape_cast %28 : vector<1x1x128xf32> to vector<1x128xf32>
    %30 = vector.broadcast %29 : vector<1x128xf32> to vector<16x128xf32>
    %31 = arith.addf %27, %30 : vector<16x128xf32>
    %c0_16 = arith.constant 0 : index
    %c0_17 = arith.constant 0 : index
    %c0_18 = arith.constant 0 : index
    %32 = vector.load %arg6[%c0_16, %c0_17, %c0_18] : memref<2x128x128xf32, #tpu.memory_space<vmem>>, vector<1x128x128xf32>
    %33 = vector.shape_cast %32 : vector<1x128x128xf32> to vector<128x128xf32>
    %cst_19 = arith.constant dense<0.000000e+00> : vector<16x128xf32>
    %34 = tpu.matmul %31, %33, %cst_19 {dimension_numbers = #tpu.dot_dimension_numbers<[1], [0], [0], [1], [0, 0, 1, 1], [], []>} : vector<16x128xf32>, vector<128x128xf32>, vector<16x128xf32> -> vector<16x128xf32>
    %c0_20 = arith.constant 0 : index
    %c0_21 = arith.constant 0 : index
    %c0_22 = arith.constant 0 : index
    %35 = vector.load %arg7[%c0_20, %c0_21, %c0_22] : memref<2x1x128xf32, #tpu.memory_space<vmem>>, vector<1x1x128xf32>
    %36 = vector.shape_cast %35 : vector<1x1x128xf32> to vector<1x128xf32>
    %37 = vector.broadcast %36 : vector<1x128xf32> to vector<16x128xf32>
    %38 = arith.addf %34, %37 : vector<16x128xf32>
    %cst_23 = arith.constant 5.000000e-01 : f32
    %39 = vector.broadcast %cst_23 : f32 to vector<16x128xf32>
    %40 = arith.mulf %39, %38 : vector<16x128xf32>
    %cst_24 = arith.constant 0.707106769 : f32
    %41 = vector.broadcast %cst_24 : f32 to vector<16x128xf32>
    %42 = arith.mulf %38, %41 : vector<16x128xf32>
    %43 = math.erf %42 : vector<16x128xf32>
    %cst_25 = arith.constant 1.000000e+00 : f32
    %44 = vector.broadcast %cst_25 : f32 to vector<16x128xf32>
    %45 = arith.addf %44, %43 : vector<16x128xf32>
    %46 = arith.mulf %40, %45 : vector<16x128xf32>
    %c0_26 = arith.constant 0 : index
    %c0_27 = arith.constant 0 : index
    %c0_28 = arith.constant 0 : index
    %47 = vector.load %arg8[%c0_26, %c0_27, %c0_28] : memref<2x128x128xf32, #tpu.memory_space<vmem>>, vector<1x128x128xf32>
    %48 = vector.shape_cast %47 : vector<1x128x128xf32> to vector<128x128xf32>
    %cst_29 = arith.constant dense<0.000000e+00> : vector<16x128xf32>
    %49 = tpu.matmul %46, %48, %cst_29 {dimension_numbers = #tpu.dot_dimension_numbers<[1], [0], [0], [1], [0, 0, 1, 1], [], []>} : vector<16x128xf32>, vector<128x128xf32>, vector<16x128xf32> -> vector<16x128xf32>
    %50 = arith.addf %5, %49 : vector<16x128xf32>
    %c0_30 = arith.constant 0 : index
    %c0_31 = arith.constant 0 : index
    %c0_32 = arith.constant 0 : index
    %51 = vector.load %arg9[%c0_30, %c0_31, %c0_32] : memref<2x1x128xf32, #tpu.memory_space<vmem>>, vector<1x1x128xf32>
    %52 = vector.shape_cast %51 : vector<1x1x128xf32> to vector<1x128xf32>
    %53 = vector.broadcast %52 : vector<1x128xf32> to vector<16x128xf32>
    %54 = arith.addf %50, %53 : vector<16x128xf32>
    %cst_33 = arith.constant dense<0.000000e+00> : vector<16xf32>
    %55 = vector.multi_reduction <add>, %54, %cst_33 [1] : vector<16x128xf32> to vector<16xf32>
    %56 = vector.shape_cast %55 : vector<16xf32> to vector<16x1xf32>
    %57 = arith.mulf %54, %54 : vector<16x128xf32>
    %cst_34 = arith.constant dense<0.000000e+00> : vector<16xf32>
    %58 = vector.multi_reduction <add>, %57, %cst_34 [1] : vector<16x128xf32> to vector<16xf32>
    %59 = vector.shape_cast %58 : vector<16xf32> to vector<16x1xf32>
    %cst_35 = arith.constant 3.125000e-02 : f32
    %60 = vector.broadcast %cst_35 : f32 to vector<16x1xf32>
    %61 = arith.mulf %56, %60 : vector<16x1xf32>
    %cst_36 = arith.constant 3.125000e-02 : f32
    %62 = vector.broadcast %cst_36 : f32 to vector<16x1xf32>
    %63 = arith.mulf %59, %62 : vector<16x1xf32>
    %64 = arith.mulf %61, %61 : vector<16x1xf32>
    %65 = arith.subf %63, %64 : vector<16x1xf32>
    %66 = vector.broadcast %61 : vector<16x1xf32> to vector<16x128xf32>
    %67 = arith.subf %54, %66 : vector<16x128xf32>
    %cst_37 = arith.constant 9.99999974E-6 : f32
    %68 = vector.broadcast %cst_37 : f32 to vector<16x1xf32>
    %69 = arith.addf %65, %68 : vector<16x1xf32>
    %70 = math.rsqrt %69 : vector<16x1xf32>
    %71 = vector.broadcast %70 : vector<16x1xf32> to vector<16x128xf32>
    %72 = arith.mulf %67, %71 : vector<16x128xf32>
    %c1 = arith.constant 1 : index
    %c0_38 = arith.constant 0 : index
    %c0_39 = arith.constant 0 : index
    %73 = vector.load %arg4[%c1, %c0_38, %c0_39] : memref<2x1x128xf32, #tpu.memory_space<vmem>>, vector<1x1x128xf32>
    %74 = vector.shape_cast %73 : vector<1x1x128xf32> to vector<1x128xf32>
    %75 = vector.broadcast %74 : vector<1x128xf32> to vector<16x128xf32>
    %76 = arith.mulf %72, %75 : vector<16x128xf32>
    %c1_40 = arith.constant 1 : index
    %c0_41 = arith.constant 0 : index
    %c0_42 = arith.constant 0 : index
    %77 = vector.load %arg5[%c1_40, %c0_41, %c0_42] : memref<2x1x128xf32, #tpu.memory_space<vmem>>, vector<1x1x128xf32>
    %78 = vector.shape_cast %77 : vector<1x1x128xf32> to vector<1x128xf32>
    %79 = vector.broadcast %78 : vector<1x128xf32> to vector<16x128xf32>
    %80 = arith.addf %76, %79 : vector<16x128xf32>
    %c1_43 = arith.constant 1 : index
    %c0_44 = arith.constant 0 : index
    %c0_45 = arith.constant 0 : index
    %81 = vector.load %arg6[%c1_43, %c0_44, %c0_45] : memref<2x128x128xf32, #tpu.memory_space<vmem>>, vector<1x128x128xf32>
    %82 = vector.shape_cast %81 : vector<1x128x128xf32> to vector<128x128xf32>
    %cst_46 = arith.constant dense<0.000000e+00> : vector<16x128xf32>
    %83 = tpu.matmul %80, %82, %cst_46 {dimension_numbers = #tpu.dot_dimension_numbers<[1], [0], [0], [1], [0, 0, 1, 1], [], []>} : vector<16x128xf32>, vector<128x128xf32>, vector<16x128xf32> -> vector<16x128xf32>
    %c1_47 = arith.constant 1 : index
    %c0_48 = arith.constant 0 : index
    %c0_49 = arith.constant 0 : index
    %84 = vector.load %arg7[%c1_47, %c0_48, %c0_49] : memref<2x1x128xf32, #tpu.memory_space<vmem>>, vector<1x1x128xf32>
    %85 = vector.shape_cast %84 : vector<1x1x128xf32> to vector<1x128xf32>
    %86 = vector.broadcast %85 : vector<1x128xf32> to vector<16x128xf32>
    %87 = arith.addf %83, %86 : vector<16x128xf32>
    %cst_50 = arith.constant 5.000000e-01 : f32
    %88 = vector.broadcast %cst_50 : f32 to vector<16x128xf32>
    %89 = arith.mulf %88, %87 : vector<16x128xf32>
    %cst_51 = arith.constant 0.707106769 : f32
    %90 = vector.broadcast %cst_51 : f32 to vector<16x128xf32>
    %91 = arith.mulf %87, %90 : vector<16x128xf32>
    %92 = math.erf %91 : vector<16x128xf32>
    %cst_52 = arith.constant 1.000000e+00 : f32
    %93 = vector.broadcast %cst_52 : f32 to vector<16x128xf32>
    %94 = arith.addf %93, %92 : vector<16x128xf32>
    %95 = arith.mulf %89, %94 : vector<16x128xf32>
    %c1_53 = arith.constant 1 : index
    %c0_54 = arith.constant 0 : index
    %c0_55 = arith.constant 0 : index
    %96 = vector.load %arg8[%c1_53, %c0_54, %c0_55] : memref<2x128x128xf32, #tpu.memory_space<vmem>>, vector<1x128x128xf32>
    %97 = vector.shape_cast %96 : vector<1x128x128xf32> to vector<128x128xf32>
    %cst_56 = arith.constant dense<0.000000e+00> : vector<16x128xf32>
    %98 = tpu.matmul %95, %97, %cst_56 {dimension_numbers = #tpu.dot_dimension_numbers<[1], [0], [0], [1], [0, 0, 1, 1], [], []>} : vector<16x128xf32>, vector<128x128xf32>, vector<16x128xf32> -> vector<16x128xf32>
    %99 = arith.addf %54, %98 : vector<16x128xf32>
    %c1_57 = arith.constant 1 : index
    %c0_58 = arith.constant 0 : index
    %c0_59 = arith.constant 0 : index
    %100 = vector.load %arg9[%c1_57, %c0_58, %c0_59] : memref<2x1x128xf32, #tpu.memory_space<vmem>>, vector<1x1x128xf32>
    %101 = vector.shape_cast %100 : vector<1x1x128xf32> to vector<1x128xf32>
    %102 = vector.broadcast %101 : vector<1x128xf32> to vector<16x128xf32>
    %103 = arith.addf %99, %102 : vector<16x128xf32>
    %c0_60 = arith.constant 0 : index
    %c0_61 = arith.constant 0 : index
    %104 = vector.load %arg10[%c0_60, %c0_61] : memref<128x128xf32, #tpu.memory_space<vmem>>, vector<128x128xf32>
    %cst_62 = arith.constant dense<0.000000e+00> : vector<16x128xf32>
    %105 = tpu.matmul %103, %104, %cst_62 {dimension_numbers = #tpu.dot_dimension_numbers<[1], [0], [0], [1], [0, 0, 1, 1], [], []>} : vector<16x128xf32>, vector<128x128xf32>, vector<16x128xf32> -> vector<16x128xf32>
    %c0_63 = arith.constant 0 : index
    %c0_64 = arith.constant 0 : index
    %106 = vector.load %arg11[%c0_63, %c0_64] : memref<1x128xf32, #tpu.memory_space<vmem>>, vector<1x128xf32>
    %107 = vector.broadcast %106 : vector<1x128xf32> to vector<16x128xf32>
    %108 = arith.addf %105, %107 : vector<16x128xf32>
    %c0_65 = arith.constant 0 : index
    %c0_66 = arith.constant 0 : index
    %109 = vector.load %arg12[%c0_65, %c0_66] : memref<16x128xf32, #tpu.memory_space<vmem>>, vector<16x128xf32>
    tpu.vector_store %arg12[%c0_65, %c0_66], %108 {strides = array<i32>} : memref<16x128xf32, #tpu.memory_space<vmem>>, vector<16x128xf32>,
    return
  }
  func.func @transform_0(%arg0: i32) -> (i32, i32) {
    %c0_i32 = arith.constant 0 : i32
    %c0_i32_0 = arith.constant 0 : i32
    return %arg0, %c0_i32 : i32, i32
  }
  func.func @transform_1(%arg0: i32) -> (i32, i32) {
    %c0_i32 = arith.constant 0 : i32
    %c0_i32_0 = arith.constant 0 : i32
    %c0_i32_1 = arith.constant 0 : i32
    return %c0_i32, %c0_i32_0 : i32, i32
  }
  func.func @transform_2(%arg0: i32) -> (i32, i32) {
    %c0_i32 = arith.constant 0 : i32
    %c0_i32_0 = arith.constant 0 : i32
    %c0_i32_1 = arith.constant 0 : i32
    return %c0_i32, %c0_i32_0 : i32, i32
  }
  func.func @transform_3(%arg0: i32) -> (i32, i32, i32) {
    %c0_i32 = arith.constant 0 : i32
    %c0_i32_0 = arith.constant 0 : i32
    %c0_i32_1 = arith.constant 0 : i32
    %c0_i32_2 = arith.constant 0 : i32
    return %c0_i32, %c0_i32_0, %c0_i32_1 : i32, i32, i32
  }
  func.func @transform_4(%arg0: i32) -> (i32, i32, i32) {
    %c0_i32 = arith.constant 0 : i32
    %c0_i32_0 = arith.constant 0 : i32
    %c0_i32_1 = arith.constant 0 : i32
    %c0_i32_2 = arith.constant 0 : i32
    return %c0_i32, %c0_i32_0, %c0_i32_1 : i32, i32, i32
  }
  func.func @transform_5(%arg0: i32) -> (i32, i32, i32) {
    %c0_i32 = arith.constant 0 : i32
    %c0_i32_0 = arith.constant 0 : i32
    %c0_i32_1 = arith.constant 0 : i32
    %c0_i32_2 = arith.constant 0 : i32
    return %c0_i32, %c0_i32_0, %c0_i32_1 : i32, i32, i32
  }
  func.func @transform_6(%arg0: i32) -> (i32, i32, i32) {
    %c0_i32 = arith.constant 0 : i32
    %c0_i32_0 = arith.constant 0 : i32
    %c0_i32_1 = arith.constant 0 : i32
    %c0_i32_2 = arith.constant 0 : i32
    return %c0_i32, %c0_i32_0, %c0_i32_1 : i32, i32, i32
  }
  func.func @transform_7(%arg0: i32) -> (i32, i32, i32) {
    %c0_i32 = arith.constant 0 : i32
    %c0_i32_0 = arith.constant 0 : i32
    %c0_i32_1 = arith.constant 0 : i32
    %c0_i32_2 = arith.constant 0 : i32
    return %c0_i32, %c0_i32_0, %c0_i32_1 : i32, i32, i32
  }
  func.func @transform_8(%arg0: i32) -> (i32, i32, i32) {
    %c0_i32 = arith.constant 0 : i32
    %c0_i32_0 = arith.constant 0 : i32
    %c0_i32_1 = arith.constant 0 : i32
    %c0_i32_2 = arith.constant 0 : i32
    return %c0_i32, %c0_i32_0, %c0_i32_1 : i32, i32, i32
  }
  func.func @transform_9(%arg0: i32) -> (i32, i32) {
    %c0_i32 = arith.constant 0 : i32
    %c0_i32_0 = arith.constant 0 : i32
    %c0_i32_1 = arith.constant 0 : i32
    return %c0_i32, %c0_i32_0 : i32, i32
  }
  func.func @transform_10(%arg0: i32) -> (i32, i32) {
    %c0_i32 = arith.constant 0 : i32
    %c0_i32_0 = arith.constant 0 : i32
    %c0_i32_1 = arith.constant 0 : i32
    return %c0_i32, %c0_i32_0 : i32, i32
  }
  func.func @transform_11(%arg0: i32) -> (i32, i32) {
    %c0_i32 = arith.constant 0 : i32
    %c0_i32_0 = arith.constant 0 : i32
    return %arg0, %c0_i32 : i32, i32
  }
}

</mosaic_0001>

<bundles_post_ra>
// kernel: tpu_custom_call.1
= control target key start
LH: loop header
LB: loop body
LE: loop exit
PB: predicated region body
PF: predicated region fallthrough
CT: control target
= control target key end

     0   :  { %s2332_s0 = inlined_call_operand.hbm [shape: f32[32,128], index: 0, kind: input, shape index: {}]   ;;  %s2333_s1 = inlined_call_operand.hbm [shape: f32[128,128], index: 1, kind: input, shape index: {}]   ;;  %s2334_s2 = inlined_call_operand.vmem [shape: f32[1,128], index: 2, kind: input, shape index: {}]   ;;  %s2335_s3 = inlined_call_operand.vmem [shape: f32[2,1,128], index: 3, kind: input, shape index: {}]   ;;  %s2336_s4 = inlined_call_operand.vmem [shape: f32[2,1,128], index: 4, kind: input, shape index: {}]   ;;  %s2337_s5 = inlined_call_operand.hbm [shape: f32[2,128,128], index: 5, kind: input, shape index: {}]   ;;  %s2338_s6 = inlined_call_operand.vmem [shape: f32[2,1,128], index: 6, kind: input, shape index: {}]   ;;  %s2339_s7 = inlined_call_operand.hbm [shape: f32[2,128,128], index: 7, kind: input, shape index: {}]   ;;  %s2340_s8 = inlined_call_operand.vmem [shape: f32[2,1,128], index: 8, kind: input, shape index: {}]   ;;  %s2341_s9 = inlined_call_operand.hbm [shape: f32[128,128], index: 9, kind: input, shape index: {}]   ;;  %s2342_s10 = inlined_call_operand.vmem [shape: f32[1,128], index: 10, kind: input, shape index: {}]   ;;  %s2343_s11 = inlined_call_operand.hbm [shape: f32[32,128], index: 11, kind: output, shape index: {}]  }
   0x1   :  { %2350 = sst [smem:[#allocation17_spill]] %s2333_s1 }
   0x2   :  { %2351 = sst [smem:[#allocation18_spill]] %s2337_s5 }
   0x3   :  { %2352 = sst [smem:[#allocation19_spill]] %s2339_s7 }
   0x4   :  { %2353 = sst [smem:[#allocation20_spill]] %s2341_s9 }
   0x5   :  { %16 = vsyncpa [#allocation3], 0 }
   0x6   :  { %18 = vsyncpa [#allocation3 + $0x1], 0 }
   0x7   :  { %19 = vsyncpa [#allocation6], 0 }
   0x8   :  { %20 = vsyncpa [#allocation9], 0 }
   0x9   :  { %21 = vsyncpa [#allocation4], 0 }
   0xa   :  { %23 = vsyncpa [#allocation4 + $0x1], 0  ;;  %s2043_s17 = smov 0   ;;  %s2045_s18 = smov 0  }
   0xb   :  { %s2047_s19 = smov 0   ;;  %s2049_s20 = smov 0  }
   0xc LB: > { %s2064_s21 = sadd.s32 4294967295, %s1971_s20   ;;  %s1304_s22 = sadd.s32 4294967294, %s1971_s20   ;;  %s1971_s20 = sphi %s2049_s20, %s2380_s20   ;;  %s1967_s19 = sphi %s2047_s19, %s2379_s19   ;;  %s1963_s18 = sphi %s2045_s18, %s2378_s18   ;;  %s1959_s17 = sphi %s2043_s17, %s2377_s17  }
   0xd   : > { %p49_p0 = scmp.ne.s32.totalorder %s1963_s18, %s1959_s17  ;;  %p2344_p1 = scmp.eq.s32.totalorder %s2064_s21, 0 }
   0xe   : > { %p283_p2 = scmp.eq.s32.totalorder %s2064_s21, 1  ;;  %p289_p3 = scmp.eq.s32.totalorder %s1304_s22, 1 }
   0xf   : > { %p2073_p4 = por %p2344_p1, %p49_p0  ;;  %p1305_p5 = scmp.ge.s32.totalorder %s1971_s20, 1 }
  0x10   : > { %p2078_p6 = por %p289_p3, %p49_p0  ;;  %p296_p7 = scmp.lt.s32.totalorder %s1971_s20, 3 }
  0x11   : > { %s2354_s23 = scalar_select %p2073_p4, 1, 0 }
  0x12   : > { %s2355_s24 = scalar_select %p2078_p6, 1, 0 }
  0x13   : > { %p2083_p8 = pnand %p1305_p5, %p296_p7  ;;  %s1973_s26 = smov [#allocation5]  }
  0x14   : > { %s308_s27 = sshll.u32 %s1973_s26, 4  ;;  %s1974_s29 = smov [#allocation8]   ;;  %s309_s27 = int_to_ptr.vmem [resolvable:$true] %s308_s27 }
  0x15   : > { %s2356_s25 = scalar_select %p2083_p8, 1, 0 }
  0x16   : > { %p1680_p9 = pneg %p2083_p8  ;;  %s346_s30 = sshll.u32 %s1974_s29, 4  ;;  %s347_s30 = int_to_ptr.vmem [resolvable:$true] %s346_s30 }
  0x17   : > { %s1975_s12 = smov [#allocation7]   ;;  %s1778_s14 = scalar_lea.vmem %s309_s27, 2048 }
  0x18   : > { %p2092_p11 = pnand %p1680_p9, %p2344_p1  ;;  %s330_s13 = sshll.u32 %s1975_s12, 4  ;;  %s331_s13 = int_to_ptr.vmem [resolvable:$true] %s330_s13 }
  0x19   : > { %p1779_p13 = scmp.ne.s32.totalorder %s309_s27, %s1778_s14  ;;  %p1786_p5 = scmp.lt.s32.totalorder %s309_s27, %s309_s27 }
  0x1a   : > { %p1769_p12 = pneg %p2092_p11  ;;  %p1787_p7 = scmp.lt.s32.totalorder %s1778_s14, %s1778_s14 }
  0x1c   : > { %p1781_p0 = pnand %p1779_p13, %p1769_p12  ;;  %p1788_p9 = por %p1787_p7, %p1786_p5 }
  0x1e   : > { %p1782_p3 = pneg %p1781_p0 }
  0x20   : > { %p1789_p10 = pnand %p1788_p9, %p1782_p3 }
  0x22   : > { %1792 = shalt.err (!%p1789_p10)
}
  0x23   : > { %s2345_s15 = smov 128   ;;  %s2346_s16 = smov 8  }
  0x24   : > { %s2358_s1 = sld [smem:[#allocation17_spill]]  ;;  %s1804_s29 = scalar_lea.vmem %s347_s30, 4096 }
  0x25   : > { %p1805_p13 = scmp.ne.s32.totalorder %s347_s30, %s1804_s29  ;;  %p1812_p3 = scmp.lt.s32.totalorder %s347_s30, %s347_s30 }
  0x26   : > { %p1813_p10 = scmp.lt.s32.totalorder %s1804_s29, %s1804_s29 }
  0x27   : > { %p1807_p0 = pnand %p1805_p13, %p1769_p12 }
  0x28   : > { %p1814_p7 = por %p1813_p10, %p1812_p3 }
  0x29   : > { %p1808_p5 = pneg %p1807_p0 }
  0x2a   : > { %1683 = dma.hbm_to_vmem [thread:$0]  (!%p2092_p11), %s2358_s1, 2048, %s309_s27, [#allocation6], %s2345_s15, %s2345_s15, %s2346_s16  }
  0x2b   : > { %p1815_p9 = pnand %p1814_p7, %p1808_p5 }
  0x2d   : > { %1818 = shalt.err (!%p1815_p9)
}
  0x2e   : > { %s2359_s7 = sld [smem:[#allocation19_spill]]  ;;  %s1830_s27 = scalar_lea.vmem %s331_s13, 4096 }
  0x2f   : > { %p1831_p1 = scmp.ne.s32.totalorder %s331_s13, %s1830_s27  ;;  %p1838_p3 = scmp.lt.s32.totalorder %s331_s13, %s331_s13 }
  0x30   : > { %p1839_p5 = scmp.lt.s32.totalorder %s1830_s27, %s1830_s27 }
  0x31   : > { %p1833_p13 = pnand %p1831_p1, %p1769_p12 }
  0x32   : > { %p1840_p10 = por %p1839_p5, %p1838_p3 }
  0x33   : > { %p1834_p0 = pneg %p1833_p13 }
  0x34   : > { %1689 = dma.hbm_to_vmem [thread:$0]  (!%p2092_p11), %s2359_s7, 4096, %s347_s30, [#allocation9], %s2345_s15, %s2345_s15, %s2346_s16  }
  0x35   : > { %p1841_p7 = pnand %p1840_p10, %p1834_p0 }
  0x37   : > { %1844 = shalt.err (!%p1841_p7)
}
  0x38   : > { %s2360_s5 = sld [smem:[#allocation18_spill]]  ;;  %s1978_s30 = smov [#allocation10]  }
  0x39   : > { %s362_s29 = sshll.u32 %s1978_s30, 4  ;;  %s363_s29 = int_to_ptr.vmem [resolvable:$true] %s362_s29 }
  0x3a   : > { %s1856_s12 = scalar_lea.vmem %s363_s29, 2048  ;;  %p1864_p0 = scmp.lt.s32.totalorder %s363_s29, %s363_s29 }
  0x3b   : > { %p1857_p1 = scmp.ne.s32.totalorder %s363_s29, %s1856_s12  ;;  %p1865_p3 = scmp.lt.s32.totalorder %s1856_s12, %s1856_s12 }
  0x3d   : > { %p1859_p9 = pnand %p1857_p1, %p1769_p12  ;;  %p1866_p5 = por %p1865_p3, %p1864_p0 }
  0x3e   : > { %1686 = dma.hbm_to_vmem [thread:$0]  (!%p2092_p11), %s2360_s5, 4096, %s331_s13, [#allocation6], %s2345_s15, %s2345_s15, %s2346_s16  }
  0x3f   : > { %p1860_p13 = pneg %p1859_p9 }
  0x41   : > { %p1867_p10 = pnand %p1866_p5, %p1860_p13 }
  0x43   : > { %1870 = shalt.err (!%p1867_p10)
}
  0x44   : > { %s2361_s9 = sld [smem:[#allocation20_spill]]  ;;  %s2143_s27 = sadd.s32 1, %s1971_s20  }
  0x45   : > { %s36_s28 = sadd.s32 1, %s1967_s19  ;;  %s33_s22 = ssub.s32 %s1971_s20, %s2143_s27 }
  0x46   : > { %p43_p12 = scmp.ne.s32.totalorder %s1967_s19, %s1963_s18  ;;  %p34_p7 = scmp.eq.s32.totalorder %s33_s22, 0 }
  0x47   : > { %p44_p1 = scmp.eq.s32.totalorder %s1971_s20, 0  ;;  %p1705_p13 = scmp.lt.s32.totalorder %s1971_s20, 2 }
  0x48   : > { %p2153_p9 = por %p283_p2, %p43_p12  ;;  %s379_s12 = sand.u32 1, %s1967_s19  }
  0x49   : > { %s2159_s30 = scalar_select %p34_p7, %s1967_s19, %s36_s28  }
  0x4a   : > { %1692 = dma.hbm_to_vmem [thread:$0]  (!%p2092_p11), %s2361_s9, 2048, %s363_s29, [#allocation9], %s2345_s15, %s2345_s15, %s2346_s16  }
  0x4b   : > { %s2362_s26 = scalar_select %p2153_p9, 1, 0 }
  0x4c   : > { %2363 = sst [smem:[#allocation16_spill]] %s2159_s30  ;;  %p45_p0 = por %p44_p1, %p43_p12 }
  0x4d   : > { %s1311_s13 = sshll.u32 %s379_s12, 4  ;;  %s1340_s29 = sshll.u32 %s1971_s20, 8 }
  0x4e   : > { %s2166_s16 = scalar_lea.hbm %s2332_s0, %s1340_s29  ;;  %s383_s22 = scalar_lea.vmem [#allocation2], %s1311_s13 }
  0x4f   : > { %s390_s1 = sshll.u32 %s383_s22, 4  ;;  %p2170_p2 = pnand %p1705_p13, %p45_p0  ;;  %s2168_s1 = int_to_ptr.vmem [resolvable:$true] %s390_s1 }
  0x50   : > { %s2174_s28 = scalar_lea.sflag [#allocation3], %s379_s12  ;;  %s1871_s7 = scalar_lea.hbm %s2166_s16, 256 }
  0x51   : > { %p1872_p11 = scmp.ne.s32.totalorder %s2166_s16, %s1871_s7  ;;  %p1873_p3 = pneg %p2170_p2 }
  0x52   : > { %s1876_s13 = scalar_lea.hbm %s2332_s0, 512  ;;  %p1877_p12 = scmp.lt.s32.totalorder %s2166_s16, %s2332_s0 }
  0x53   : > { %p1874_p5 = pnand %p1873_p3, %p1872_p11  ;;  %p1878_p7 = scmp.lt.s32.totalorder %s1876_s13, %s1871_s7 }
  0x55   : > { %p1875_p10 = pneg %p1874_p5  ;;  %p1879_p1 = por %p1878_p7, %p1877_p12 }
  0x57   : > { %p1880_p13 = pnand %p1879_p1, %p1875_p10 }
  0x59   : > { %1883 = shalt.err (!%p1880_p13)
}
  0x5a   : > { %s1884_s12 = scalar_lea.vmem %s2168_s1, 256  ;;  %s1979_s9 = smov [#allocation2]  }
  0x5b   : > { %p1885_p0 = scmp.ne.s32.totalorder %s2168_s1, %s1884_s12  ;;  %s1889_s30 = sshll.u32 %s1979_s9, 4  ;;  %s1890_s30 = int_to_ptr.vmem [resolvable:$false] %s1889_s30 }
  0x5c   : > { %s1891_s15 = scalar_lea.vmem %s1890_s30, 512  ;;  %p1892_p5 = scmp.lt.s32.totalorder %s2168_s1, %s1890_s30 }
  0x5d   : > { %p1887_p6 = pnand %p1885_p0, %p1873_p3  ;;  %p1893_p9 = scmp.lt.s32.totalorder %s1891_s15, %s1884_s12 }
  0x5f   : > { %p1888_p11 = pneg %p1887_p6  ;;  %p1894_p4 = por %p1893_p9, %p1892_p5 }
  0x61   : > { %p1895_p8 = pnand %p1894_p4, %p1888_p11 }
  0x63   : > { %1898 = shalt.err (!%p1895_p8)
}
  0x64   : > { %s2365_s7 = smov 8   ;;  %s2366_s29 = smov 128  }
  0x65   : > { %1696 = dma.hbm_to_vmem [thread:$0]  (!%p2170_p2), %s2166_s16, 256, %s2168_s1, %s2174_s28, %s2366_s29, %s2366_s29, %s2365_s7  }
  0x66   : > { %p2367_p6 = scmp.ne.s32.totalorder %s2356_s25, 0 }
  0x67   : > { %s2201_s9 = sand.u32 (!%p2367_p6), 1, %s1963_s18   ;;  %p2368_p4 = scmp.ne.s32.totalorder (!%p2367_p6), %s2354_s23, 0 }
  0x68   : > { %402 = sbr.rel (%p2367_p6) target bundleno = 1731 (0x6c3), region = 64  ;;  %s1315_s30 = sshll.u32 (!%p2367_p6), %s2201_s9, 4 }
  0x69   : > { %s405_s13 = scalar_lea.sflag (!%p2367_p6), [#allocation3], %s2201_s9  ;;  %s2207_s5 = scalar_lea.vmem (!%p2367_p6), [#allocation2], %s1315_s30 }
  0x6d   : > { %1942 = dma.done.wait (%p2368_p4), %s405_s13, 256  }
  0x6e   : > { %1944 = vsyncadd (%p2368_p4), %s405_s13, 4294967040  ;;  %p2369_p8 = scmp.eq.s32.totalorder %s2064_s21, 0 }
  0x70   : > { %1946 = dma.done.wait (%p2369_p8), [#allocation6], 6144   ;;  %p2370_p9 = pmov %p2369_p8 }
  0x71   : > { %p2371_p2 = pmov %p2369_p8 }
  0x72   : > { %1948 = vsyncadd (%p2370_p9), [#allocation6], 4294961152 }
  0x73   : > { %1950 = dma.done.wait (%p2371_p2), [#allocation9], 6144   ;;  %p2372_p3 = pmov %p2371_p2 }
  0x74   : > { %v482_v0 = vld [vmem:[#allocation5 + $0x78] sm:$0xff]  ;;  %v481_v1 = vld [vmem:[#allocation5 + $0x70] sm:$0xff]  ;;  %v480_v2 = vld [vmem:[#allocation5 + $0x68] sm:$0xff]  ;;  %s462_s12 = scalar_lea.vmem [#allocation11], %s1315_s30  ;;  %s1341_s7 = sshll.u32 %s2064_s21, 8 }
  0x75   : > { %1952 = vsyncadd (%p2372_p3), [#allocation9], 4294961152  ;;  %1450 = vmatprep.subr.mxu0 %v482_v0  ;;  %v479_v3 = vld [vmem:[#allocation5 + $0x60] sm:$0xff]  ;;  %v478_v5 = vld [vmem:[#allocation5 + $0x58] sm:$0xff]  ;;  %s1193_s15 = sshll.u32 %s462_s12, 4  ;;  %s1180_s1 = scalar_lea.sflag [#allocation4], %s2201_s9  ;;  %s2284_s15 = int_to_ptr.vmem [resolvable:$true] %s1193_s15 }
  0x76   : > { %1451 = vmatpush3.msra.mxu0 %v482_v0  ;;  %v465_v4 = vld [vmem:[%s2207_s5] sm:$0xff]  ;;  %v476_v7 = vld [vmem:[#allocation5 + $0x48] sm:$0xff]  ;;  %v474_v9 = vld [vmem:[#allocation5 + $0x38] sm:$0xff]  ;;  %s1899_s30 = scalar_lea.vmem %s2284_s15, 256  ;;  %p2373_p12 = scmp.ne.s32.totalorder %s2362_s26, 0 }
  0x77   : > { %1452 = vmatprep.subr.mxu0 %v481_v1  ;;  %1482 = vmatprep.mubr.f32.mxu0 %v465_v4  ;;  %v477_v6 = vld [vmem:[#allocation5 + $0x50] sm:$0xff]  ;;  %v475_v8 = vld [vmem:[#allocation5 + $0x40] sm:$0xff]  ;;  %v472_v11 = vld [vmem:[#allocation5 + $0x28] sm:$0xff]  ;;  %p1900_p10 = scmp.ne.s32.totalorder %s2284_s15, %s1899_s30  ;;  %s1980_s21 = smov [#allocation11]  }
  0x78   : > { %1453 = vmatpush3.msra.mxu0 %v481_v1  ;;  %v473_v10 = vld [vmem:[#allocation5 + $0x30] sm:$0xff]  ;;  %v471_v12 = vld [vmem:[#allocation5 + $0x20] sm:$0xff]  ;;  %v470_v13 = vld [vmem:[#allocation5 + $0x18] sm:$0xff]  ;;  %s1903_s23 = sshll.u32 %s1980_s21, 4  ;;  %s1904_s23 = int_to_ptr.vmem [resolvable:$false] %s1903_s23 }
  0x79   : > { %1454 = vmatprep.subr.mxu0 %v480_v2  ;;  %v469_v14 = vld [vmem:[#allocation5 + $0x10] sm:$0xff]  ;;  %v468_v15 = vld [vmem:[#allocation5 + $0x8] sm:$0xff]  ;;  %v467_v16 = vld [vmem:[#allocation5] sm:$0xff]  ;;  %p1901_p7 = pnand %p1900_p10, %p2373_p12  ;;  %s1905_s25 = scalar_lea.vmem %s1904_s23, 512 }
  0x7a   : > { %1455 = vmatpush3.msra.mxu0 %v480_v2  ;;  %v466_v17 = vld [vmem:[%s2207_s5 + $0x8] sm:$0xff]  ;;  %v1321_v19 = vld [vmem:[%s2334_s2] ss:$0 sm:$0xff]  ;;  %v623_v26 = vld [vmem:[#allocation7 + $0x70] sm:$0xff]  ;;  %s2289_s5 = scalar_lea.hbm %s2343_s11, %s1341_s7  ;;  %p1906_p13 = scmp.lt.s32.totalorder %s2284_s15, %s1904_s23 }
  0x7b   : > { %1456 = vmatprep.subr.mxu0 %v479_v3  ;;  %v624_v25 = vld [vmem:[#allocation7 + $0x78] sm:$0xff]  ;;  %v622_v27 = vld [vmem:[#allocation7 + $0x68] sm:$0xff]  ;;  %v621_v28 = vld [vmem:[#allocation7 + $0x60] sm:$0xff]  ;;  %p1902_p1 = pneg %p1901_p7  ;;  %p1907_p0 = scmp.lt.s32.totalorder %s1905_s25, %s1899_s30 }
  0x7c   : > { %1457 = vmatpush3.msra.mxu0 %v479_v3  ;;  %1485 = vmatprep.subr.mxu1 %v624_v25  ;;  %v620_v29 = vld [vmem:[#allocation7 + $0x58] sm:$0xff]  ;;  %v619_v30 = vld [vmem:[#allocation7 + $0x50] sm:$0xff]  ;;  %v618_v31 = vld [vmem:[#allocation7 + $0x48] sm:$0xff] }
  0x7d   : > { %1458 = vmatprep.subr.mxu0 %v478_v5  ;;  %1486 = vmatpush3.msra.mxu1 %v624_v25  ;;  %v617_v32 = vld [vmem:[#allocation7 + $0x40] sm:$0xff]  ;;  %v616_v33 = vld [vmem:[#allocation7 + $0x38] sm:$0xff]  ;;  %v615_v34 = vld [vmem:[#allocation7 + $0x30] sm:$0xff]  ;;  %p1908_p11 = por %p1907_p0, %p1906_p13 }
  0x7e   : > { %1459 = vmatpush3.msra.mxu0 %v478_v5  ;;  %1487 = vmatprep.subr.mxu1 %v623_v26  ;;  %v614_v35 = vld [vmem:[#allocation7 + $0x28] sm:$0xff]  ;;  %v613_v36 = vld [vmem:[#allocation7 + $0x20] sm:$0xff]  ;;  %v612_v37 = vld [vmem:[#allocation7 + $0x18] sm:$0xff] }
  0x7f   : > { %1460 = vmatprep.subr.mxu0 %v477_v6  ;;  %1488 = vmatpush3.msra.mxu1 %v623_v26  ;;  %v611_v38 = vld [vmem:[#allocation7 + $0x10] sm:$0xff]  ;;  %v610_v39 = vld [vmem:[#allocation7 + $0x8] sm:$0xff]  ;;  %v609_v40 = vld [vmem:[#allocation7] sm:$0xff]  ;;  %p1909_p5 = pnand %p1908_p11, %p1902_p1 }
  0x80   : > { %1461 = vmatpush3.msra.mxu0 %v477_v6  ;;  %1489 = vmatprep.subr.mxu1 %v622_v27  ;;  %v732_v41 = vld [vmem:[#allocation8 + $0x78] sm:$0xff]  ;;  %v731_v42 = vld [vmem:[#allocation8 + $0x70] sm:$0xff]  ;;  %v730_v43 = vld [vmem:[#allocation8 + $0x68] sm:$0xff] }
  0x81   : > { %1462 = vmatprep.subr.mxu0 %v476_v7  ;;  %1490 = vmatpush3.msra.mxu1 %v622_v27  ;;  %v1322_v60 = vld [vmem:[%s2335_s3] ss:$0 sm:$0xff] }
  0x82   : > { %1463 = vmatpush3.msra.mxu0 %v476_v7  ;;  %1491 = vmatprep.subr.mxu1 %v621_v28  ;;  %v1323_v62 = vld [vmem:[%s2336_s4] ss:$0 sm:$0xff]  ;;  %v728_v7 = vld [vmem:[#allocation8 + $0x58] sm:$0xff] }
  0x83   : > { %1464 = vmatprep.subr.mxu0 %v475_v8  ;;  %1492 = vmatpush3.msra.mxu1 %v621_v28  ;;  %v729_v6 = vld [vmem:[#allocation8 + $0x60] sm:$0xff] }
  0x84   : > { %1465 = vmatpush3.msra.mxu0 %v475_v8  ;;  %1493 = vmatprep.subr.mxu1 %v620_v29  ;;  %v727_v8 = vld [vmem:[#allocation8 + $0x50] sm:$0xff] }
  0x85   : > { %1466 = vmatprep.subr.mxu0 %v474_v9  ;;  %1494 = vmatpush3.msra.mxu1 %v620_v29 }
  0x86   : > { %1467 = vmatpush3.msra.mxu0 %v474_v9  ;;  %1495 = vmatprep.subr.mxu1 %v619_v30  ;;  %v726_v9 = vld [vmem:[#allocation8 + $0x48] sm:$0xff] }
  0x87   : > { %1468 = vmatprep.subr.mxu0 %v473_v10  ;;  %1496 = vmatpush3.msra.mxu1 %v619_v30 }
  0x88   : > { %1469 = vmatpush3.msra.mxu0 %v473_v10  ;;  %1497 = vmatprep.subr.mxu1 %v618_v31  ;;  %v725_v10 = vld [vmem:[#allocation8 + $0x40] sm:$0xff] }
  0x89   : > { %1470 = vmatprep.subr.mxu0 %v472_v11  ;;  %1498 = vmatpush3.msra.mxu1 %v618_v31 }
  0x8a   : > { %1471 = vmatpush3.msra.mxu0 %v472_v11  ;;  %1499 = vmatprep.subr.mxu1 %v617_v32  ;;  %v724_v11 = vld [vmem:[#allocation8 + $0x38] sm:$0xff] }
  0x8b   : > { %1472 = vmatprep.subr.mxu0 %v471_v12  ;;  %1500 = vmatpush3.msra.mxu1 %v617_v32 }
  0x8c   : > { %1473 = vmatpush3.msra.mxu0 %v471_v12  ;;  %1501 = vmatprep.subr.mxu1 %v616_v33  ;;  %v723_v12 = vld [vmem:[#allocation8 + $0x30] sm:$0xff] }
  0x8d   : > { %1474 = vmatprep.subr.mxu0 %v470_v13  ;;  %1502 = vmatpush3.msra.mxu1 %v616_v33 }
  0x8e   : > { %1475 = vmatpush3.msra.mxu0 %v470_v13  ;;  %1503 = vmatprep.subr.mxu1 %v615_v34  ;;  %v722_v13 = vld [vmem:[#allocation8 + $0x28] sm:$0xff] }
  0x8f   : > { %1476 = vmatprep.subr.mxu0 %v469_v14  ;;  %1504 = vmatpush3.msra.mxu1 %v615_v34 }
  0x90   : > { %1477 = vmatpush3.msra.mxu0 %v469_v14  ;;  %1505 = vmatprep.subr.mxu1 %v614_v35  ;;  %v721_v14 = vld [vmem:[#allocation8 + $0x20] sm:$0xff] }
  0x91   : > { %1478 = vmatprep.subr.mxu0 %v468_v15  ;;  %1506 = vmatpush3.msra.mxu1 %v614_v35 }
  0x92   : > { %1479 = vmatpush3.msra.mxu0 %v468_v15  ;;  %1507 = vmatprep.subr.mxu1 %v613_v36  ;;  %v720_v15 = vld [vmem:[#allocation8 + $0x18] sm:$0xff] }
  0x93   : > { %1480 = vmatprep.subr.mxu0 %v467_v16  ;;  %1508 = vmatpush3.msra.mxu1 %v613_v36 }
  0x94   : > { %1481 = vmatpush3.msra.mxu0 %v467_v16  ;;  %1509 = vmatprep.subr.mxu1 %v612_v37  ;;  %v719_v16 = vld [vmem:[#allocation8 + $0x10] sm:$0xff] }
  0x95   : > { %1483 = vmatmul.mubr.f32.vlgmr.msra.gmra.mxu0 %v466_v17  ;;  %1510 = vmatpush3.msra.mxu1 %v612_v37  ;;  %v718_v17 = vld [vmem:[#allocation8 + $0x8] sm:$0xff]  ;;  %v1325_v37 = vld [vmem:[%s2340_s8] ss:$0 sm:$0xff] }
  0x96   : > { %1511 = vmatprep.subr.mxu1 %v611_v38  ;;  %1520 = vmatprep.subr.mxu0 %v732_v41 }
  0x97   : > { %1512 = vmatpush3.msra.mxu1 %v611_v38  ;;  %1521 = vmatpush3.msra.mxu0 %v732_v41 }
  0x98   : > { %1513 = vmatprep.subr.mxu1 %v610_v39  ;;  %1522 = vmatprep.subr.mxu0 %v731_v42 }
  0x99   : > { %1514 = vmatpush3.msra.mxu1 %v610_v39  ;;  %1523 = vmatpush3.msra.mxu0 %v731_v42 }
  0x9a   : > { %1515 = vmatprep.subr.mxu1 %v609_v40  ;;  %1524 = vmatprep.subr.mxu0 %v730_v43 }
  0x9b   : > { %1516 = vmatpush3.msra.mxu1 %v609_v40  ;;  %1525 = vmatpush3.msra.mxu0 %v730_v43 }
  0x9c   : > { %1526 = vmatprep.subr.mxu0 %v729_v6 }
  0x9d   : > { %1527 = vmatpush3.msra.mxu0 %v729_v6 }
  0x9e   : > { %1528 = vmatprep.subr.mxu0 %v728_v7 }
  0x9f   : > { %1529 = vmatpush3.msra.mxu0 %v728_v7 }
  0xa0   : > { %1530 = vmatprep.subr.mxu0 %v727_v8 }
  0xa1   : > { %1531 = vmatpush3.msra.mxu0 %v727_v8 }
  0xa2   : > { %1532 = vmatprep.subr.mxu0 %v726_v9 }
  0xa3   : > { %1533 = vmatpush3.msra.mxu0 %v726_v9 }
  0xa4   : > { %1534 = vmatprep.subr.mxu0 %v725_v10 }
  0xa5   : > { %1535 = vmatpush3.msra.mxu0 %v725_v10 }
  0xa6   : > { %1536 = vmatprep.subr.mxu0 %v724_v11 }
  0xa7   : > { %1537 = vmatpush3.msra.mxu0 %v724_v11 }
  0xa8   : > { %1538 = vmatprep.subr.mxu0 %v723_v12 }
  0xa9   : > { %1539 = vmatpush3.msra.mxu0 %v723_v12 }
  0xaa   : > { %1540 = vmatprep.subr.mxu0 %v722_v13 }
  0xab   : > { %1541 = vmatpush3.msra.mxu0 %v722_v13 }
  0xac   : > { %1542 = vmatprep.subr.mxu0 %v721_v14 }
  0xad   : > { %1543 = vmatpush3.msra.mxu0 %v721_v14 }
  0xae   : > { %1544 = vmatprep.subr.mxu0 %v720_v15 }
  0xaf   : > { %1545 = vmatpush3.msra.mxu0 %v720_v15 }
  0xb0   : > { %1546 = vmatprep.subr.mxu0 %v719_v16 }
  0xb1   : > { %1547 = vmatpush3.msra.mxu0 %v719_v16  ;;  %v1327_v16 = vld [vmem:[%s2335_s3 + $0x1] ss:$0 sm:$0xff] }
  0xb2   : > { %1548 = vmatprep.subr.mxu0 %v718_v17 }
  0xb3   : > { %1549 = vmatpush3.msra.mxu0 %v718_v17 }
 0x155   : > { %v1484_v18 = vpop.f32.mrf.mxu0 }
 0x156   : > { %v2228_v22 = vadd.f32 %v1484_v18, %v1321_v19  ;;  %v717_v18 = vld [vmem:[#allocation8] sm:$0xff] }
 0x157   : > { %v556_v20 = vpop.f32.mrf.mxu0  ;;  %1550 = vmatprep.subr.mxu0 %v717_v18 }
 0x158   : > { %v2226_v21 = vadd.f32 %v1321_v19, %v556_v20  ;;  %v570_v24 = vmul.f32 %v2228_v22, %v2228_v22  ;;  %1551 = vmatpush3.msra.mxu0 %v717_v18  ;;  %v1324_v19 = vld [vmem:[%s2338_s6] ss:$0 sm:$0xff] }
 0x15a   : > { %565 = vadd.xlane.f32.xlu0 %v2226_v21  ;;  %v569_v23 = vmul.f32 %v2226_v21, %v2226_v21 }
 0x15c   : > { %571 = vadd.xlane.f32.xlu1 %v569_v23 }
 0x15e   : > { %567 = vadd.xlane.f32.xlu0 %v2228_v22 }
 0x160   : > { %573 = vadd.xlane.f32.xlu1 %v570_v24 }
 0x1e3   : > { %v566_v44 = vpop.xlane.xlu0 %565 }
 0x1e4   : > { %v575_v45 = vmul.f32 0.03125, %v566_v44 }
 0x1e5   : > { %v572_v46 = vpop.xlane.xlu1 %571 }
 0x1e6   : > { %v579_v47 = vmul.f32 %v575_v45, %v575_v45  ;;  %v577_v48 = vmul.f32 0.03125, %v572_v46  ;;  %v583_v58 = vsub.f32 %v2226_v21, %v575_v45  ;;  %v880_v45 = vld [vmem:[#allocation7 + $0xf0] sm:$0xff]  ;;  %v878_v46 = vld [vmem:[#allocation7 + $0xe0] sm:$0xff] }
 0x1e7   : > { %v568_v49 = vpop.xlane.xlu0 %567 }
 0x1e8   : > { %v581_v50 = vsub.f32 %v577_v48, %v579_v47  ;;  %v576_v51 = vmul.f32 0.03125, %v568_v49  ;;  %v877_v47 = vld [vmem:[#allocation7 + $0xd8] sm:$0xff]  ;;  %v876_v48 = vld [vmem:[#allocation7 + $0xd0] sm:$0xff]  ;;  %v875_v49 = vld [vmem:[#allocation7 + $0xc8] sm:$0xff] }
 0x1e9   : > { %v574_v52 = vpop.xlane.xlu1 %573 }
 0x1ea   : > { %v585_v53 = vadd.f32 1e-05, %v581_v50  ;;  %v580_v54 = vmul.f32 %v576_v51, %v576_v51  ;;  %v578_v55 = vmul.f32 0.03125, %v574_v52  ;;  %v584_v63 = vsub.f32 %v2228_v22, %v576_v51  ;;  %v874_v50 = vld [vmem:[#allocation7 + $0xc0] sm:$0xff]  ;;  %v873_v51 = vld [vmem:[#allocation7 + $0xb8] sm:$0xff]  ;;  %v872_v52 = vld [vmem:[#allocation7 + $0xb0] sm:$0xff] }
 0x1ec   : > { %1751 = vrsqrt.f32 %v585_v53  ;;  %v582_v56 = vsub.f32 %v578_v55, %v580_v54  ;;  %v871_v53 = vld [vmem:[#allocation7 + $0xa8] sm:$0xff]  ;;  %v870_v54 = vld [vmem:[#allocation7 + $0xa0] sm:$0xff]  ;;  %v869_v55 = vld [vmem:[#allocation7 + $0x98] sm:$0xff] }
 0x1ee   : > { %v586_v57 = vadd.f32 1e-05, %v582_v56  ;;  %v868_v56 = vld [vmem:[#allocation7 + $0x90] sm:$0xff] }
 0x1f0   : > { %1753 = vrsqrt.f32 %v586_v57  ;;  %v867_v57 = vld [vmem:[#allocation7 + $0x88] sm:$0xff] }
 0x1f9   : > { %v1752_v59 = vpop.eup %1751 }
 0x1fa   : > { %v589_v61 = vmul.f32 %v1752_v59, %v583_v58  ;;  %v866_v58 = vld [vmem:[#allocation7 + $0x80] sm:$0xff]  ;;  %v991_v59 = vld [vmem:[#allocation8 + $0xf8] sm:$0xff] }
 0x1fb   : > { %1590 = vmatprep.subr.mxu0 %v991_v59 }
 0x1fc   : > { %v598_v0 = vmul.f32 %v1322_v60, %v589_v61  ;;  %v989_v61 = vld [vmem:[#allocation8 + $0xe8] sm:$0xff] }
 0x1fd   : > { %v1754_v1 = vpop.eup %1753 }
 0x1fe   : > { %v590_v2 = vmul.f32 %v1754_v1, %v584_v63  ;;  %v607_v3 = vadd.f32 %v1323_v62, %v598_v0 }
 0x200   : > { %v599_v4 = vmul.f32 %v1322_v60, %v590_v2  ;;  %1517 = vmatprep.mubr.f32.mxu1 %v607_v3  ;;  %v990_v60 = vld [vmem:[#allocation8 + $0xf0] sm:$0xff] }
 0x202   : > { %v608_v5 = vadd.f32 %v1323_v62, %v599_v4 }
 0x204   : > { %1518 = vmatmul.mubr.f32.vlgmr.msra.gmra.mxu1 %v608_v5 }
 0x2c4   : > { %v1519_v20 = vpop.f32.mrf.mxu1 }
 0x2c5   : > { %v704_v23 = vadd.f32 %v1519_v20, %v1324_v19 }
 0x2c6   : > { %v698_v24 = vpop.f32.mrf.mxu1 }
 0x2c7   : > { %v710_v25 = vmul.f32 0.70710677, %v704_v23  ;;  %v699_v26 = vadd.f32 %v1324_v19, %v698_v24  ;;  %v708_v33 = vmul.f32 0.5, %v704_v23  ;;  %v1329_v23 = vld [vmem:[%s2336_s4 + $0x1] ss:$0 sm:$0xff] }
 0x2c9   : > { %1755 = verf.f32 %v710_v25  ;;  %v709_v27 = vmul.f32 0.70710677, %v699_v26  ;;  %v707_v31 = vmul.f32 0.5, %v699_v26  ;;  %v988_v26 = vld [vmem:[#allocation8 + $0xe0] sm:$0xff] }
 0x2cb   : > { %1757 = verf.f32 %v709_v27  ;;  %v987_v27 = vld [vmem:[#allocation8 + $0xd8] sm:$0xff] }
 0x2d6   : > { %v1756_v28 = vpop.eup %1755 }
 0x2d7   : > { %v714_v30 = vadd.f32 1.0, %v1756_v28  ;;  %v986_v28 = vld [vmem:[#allocation8 + $0xd0] sm:$0xff] }
 0x2d8   : > { %v1758_v29 = vpop.eup %1757 }
 0x2d9   : > { %v713_v32 = vadd.f32 1.0, %v1758_v29  ;;  %v716_v35 = vmul.f32 %v714_v30, %v708_v33  ;;  %v985_v29 = vld [vmem:[#allocation8 + $0xc8] sm:$0xff]  ;;  %v984_v30 = vld [vmem:[#allocation8 + $0xc0] sm:$0xff] }
 0x2da   : > { %v981_v33 = vld [vmem:[#allocation8 + $0xa8] sm:$0xff] }
 0x2db   : > { %v715_v34 = vmul.f32 %v713_v32, %v707_v31  ;;  %v983_v31 = vld [vmem:[#allocation8 + $0xb8] sm:$0xff]  ;;  %v982_v32 = vld [vmem:[#allocation8 + $0xb0] sm:$0xff] }
 0x2dd   : > { %1552 = vmatprep.mubr.f32.mxu0 %v715_v34  ;;  %v980_v34 = vld [vmem:[#allocation8 + $0xa0] sm:$0xff] }
 0x2de   : > { %1553 = vmatmul.mubr.f32.vlgmr.msra.gmra.mxu0 %v716_v35  ;;  %v979_v35 = vld [vmem:[#allocation8 + $0x98] sm:$0xff] }
 0x2df   : > { %1591 = vmatpush3.msra.mxu0 %v991_v59 }
 0x2e0   : > { %1592 = vmatprep.subr.mxu0 %v990_v60 }
 0x2e1   : > { %1593 = vmatpush3.msra.mxu0 %v990_v60 }
 0x2e2   : > { %1594 = vmatprep.subr.mxu0 %v989_v61 }
 0x2e3   : > { %1595 = vmatpush3.msra.mxu0 %v989_v61 }
 0x2e4   : > { %1596 = vmatprep.subr.mxu0 %v988_v26 }
 0x2e5   : > { %1597 = vmatpush3.msra.mxu0 %v988_v26 }
 0x2e6   : > { %1598 = vmatprep.subr.mxu0 %v987_v27 }
 0x2e7   : > { %1599 = vmatpush3.msra.mxu0 %v987_v27 }
 0x2e8   : > { %1600 = vmatprep.subr.mxu0 %v986_v28 }
 0x2e9   : > { %1601 = vmatpush3.msra.mxu0 %v986_v28 }
 0x2ea   : > { %1602 = vmatprep.subr.mxu0 %v985_v29 }
 0x2eb   : > { %1603 = vmatpush3.msra.mxu0 %v985_v29 }
 0x2ec   : > { %1604 = vmatprep.subr.mxu0 %v984_v30 }
 0x2ed   : > { %1605 = vmatpush3.msra.mxu0 %v984_v30 }
 0x2ee   : > { %1606 = vmatprep.subr.mxu0 %v983_v31 }
 0x2ef   : > { %1607 = vmatpush3.msra.mxu0 %v983_v31 }
 0x2f0   : > { %1608 = vmatprep.subr.mxu0 %v982_v32 }
 0x2f1   : > { %1609 = vmatpush3.msra.mxu0 %v982_v32 }
 0x2f2   : > { %1610 = vmatprep.subr.mxu0 %v981_v33 }
 0x2f3   : > { %1611 = vmatpush3.msra.mxu0 %v981_v33 }
 0x2f4   : > { %1612 = vmatprep.subr.mxu0 %v980_v34 }
 0x2f5   : > { %1613 = vmatpush3.msra.mxu0 %v980_v34 }
 0x2f6   : > { %1614 = vmatprep.subr.mxu0 %v979_v35 }
 0x2f7   : > { %1615 = vmatpush3.msra.mxu0 %v979_v35 }
 0x39e   : > { %v1554_v36 = vpop.f32.mrf.mxu0 }
 0x39f   : > { %v809_v38 = vadd.f32 %v1554_v36, %v2228_v22  ;;  %v881_v22 = vld [vmem:[#allocation7 + $0xf8] sm:$0xff]  ;;  %v978_v36 = vld [vmem:[#allocation8 + $0x90] sm:$0xff] }
 0x3a0   : > { %v799_v39 = vpop.f32.mrf.mxu0  ;;  %1555 = vmatprep.subr.mxu1 %v881_v22  ;;  %1616 = vmatprep.subr.mxu0 %v978_v36 }
 0x3a1   : > { %v2251_v40 = vadd.f32 %v1325_v37, %v809_v38  ;;  %v808_v41 = vadd.f32 %v799_v39, %v2226_v21  ;;  %1556 = vmatpush3.msra.mxu1 %v881_v22  ;;  %v879_v21 = vld [vmem:[#allocation7 + $0xe8] sm:$0xff]  ;;  %1617 = vmatpush3.msra.mxu0 %v978_v36  ;;  %v976_v38 = vld [vmem:[#allocation8 + $0x80] sm:$0xff]  ;;  %v1094_v39 = vld [vmem:[#allocation10 + $0x78] sm:$0xff] }
 0x3a2   : > { %1557 = vmatprep.subr.mxu1 %v880_v45  ;;  %v1090_v22 = vld [vmem:[#allocation10 + $0x58] sm:$0xff] }
 0x3a3   : > { %v2254_v42 = vadd.f32 %v1325_v37, %v808_v41  ;;  %821 = vadd.xlane.f32.xlu1 %v2251_v40  ;;  %v824_v43 = vmul.f32 %v2251_v40, %v2251_v40  ;;  %1558 = vmatpush3.msra.mxu1 %v880_v45  ;;  %v977_v37 = vld [vmem:[#allocation8 + $0x88] sm:$0xff]  ;;  %v1093_v41 = vld [vmem:[#allocation10 + $0x70] sm:$0xff] }
 0x3a4   : > { %1559 = vmatprep.subr.mxu1 %v879_v21  ;;  %1618 = vmatprep.subr.mxu0 %v977_v37  ;;  %v1089_v45 = vld [vmem:[#allocation10 + $0x50] sm:$0xff] }
 0x3a5   : > { %819 = vadd.xlane.f32.xlu0 %v2254_v42  ;;  %v823_v44 = vmul.f32 %v2254_v42, %v2254_v42  ;;  %1560 = vmatpush3.msra.mxu1 %v879_v21  ;;  %v1088_v21 = vld [vmem:[#allocation10 + $0x48] sm:$0xff] }
 0x3a6   : > { %1561 = vmatprep.subr.mxu1 %v878_v46  ;;  %1619 = vmatpush3.msra.mxu0 %v977_v37 }
 0x3a7   : > { %827 = vadd.xlane.f32.xlu1 %v824_v43  ;;  %1562 = vmatpush3.msra.mxu1 %v878_v46  ;;  %v1092_v43 = vld [vmem:[#allocation10 + $0x68] sm:$0xff]  ;;  %v1087_v46 = vld [vmem:[#allocation10 + $0x40] sm:$0xff] }
 0x3a8   : > { %1563 = vmatprep.subr.mxu1 %v877_v47  ;;  %1620 = vmatprep.subr.mxu0 %v976_v38 }
 0x3a9   : > { %825 = vadd.xlane.f32.xlu0 %v823_v44  ;;  %1564 = vmatpush3.msra.mxu1 %v877_v47  ;;  %v1091_v44 = vld [vmem:[#allocation10 + $0x60] sm:$0xff]  ;;  %v1086_v47 = vld [vmem:[#allocation10 + $0x38] sm:$0xff] }
 0x3aa   : > { %1565 = vmatprep.subr.mxu1 %v876_v48  ;;  %1621 = vmatpush3.msra.mxu0 %v976_v38 }
 0x3ab   : > { %1566 = vmatpush3.msra.mxu1 %v876_v48  ;;  %v1085_v48 = vld [vmem:[#allocation10 + $0x30] sm:$0xff] }
 0x3ac   : > { %1567 = vmatprep.subr.mxu1 %v875_v49 }
 0x3ad   : > { %1568 = vmatpush3.msra.mxu1 %v875_v49  ;;  %v1084_v49 = vld [vmem:[#allocation10 + $0x28] sm:$0xff] }
 0x3ae   : > { %1569 = vmatprep.subr.mxu1 %v874_v50 }
 0x3af   : > { %1570 = vmatpush3.msra.mxu1 %v874_v50  ;;  %v1083_v50 = vld [vmem:[#allocation10 + $0x20] sm:$0xff] }
 0x3b0   : > { %1571 = vmatprep.subr.mxu1 %v873_v51 }
 0x3b1   : > { %1572 = vmatpush3.msra.mxu1 %v873_v51  ;;  %v1331_v51 = vld [vmem:[%s2338_s6 + $0x1] ss:$0 sm:$0xff] }
 0x3b2   : > { %1573 = vmatprep.subr.mxu1 %v872_v52 }
 0x3b3   : > { %1574 = vmatpush3.msra.mxu1 %v872_v52 }
 0x3b4   : > { %1575 = vmatprep.subr.mxu1 %v871_v53 }
 0x3b5   : > { %1576 = vmatpush3.msra.mxu1 %v871_v53 }
 0x3b6   : > { %1577 = vmatprep.subr.mxu1 %v870_v54 }
 0x3b7   : > { %1578 = vmatpush3.msra.mxu1 %v870_v54 }
 0x3b8   : > { %1579 = vmatprep.subr.mxu1 %v869_v55 }
 0x3b9   : > { %1580 = vmatpush3.msra.mxu1 %v869_v55 }
 0x3ba   : > { %1581 = vmatprep.subr.mxu1 %v868_v56 }
 0x3bb   : > { %1582 = vmatpush3.msra.mxu1 %v868_v56 }
 0x3bc   : > { %1583 = vmatprep.subr.mxu1 %v867_v57 }
 0x3bd   : > { %1584 = vmatpush3.msra.mxu1 %v867_v57 }
 0x3be   : > { %1585 = vmatprep.subr.mxu1 %v866_v58 }
 0x3bf   : > { %1586 = vmatpush3.msra.mxu1 %v866_v58 }
 0x3c0   : > { %1625 = vmatprep.subr.mxu1 %v1094_v39 }
 0x42c   : > { %v822_v62 = vpop.xlane.xlu1 %821 }
 0x42d   : > { %v830_v63 = vmul.f32 0.03125, %v822_v62 }
 0x42e   : > { %v820_v0 = vpop.xlane.xlu0 %819 }
 0x42f   : > { %v829_v1 = vmul.f32 0.03125, %v820_v0  ;;  %v834_v3 = vmul.f32 %v830_v63, %v830_v63  ;;  %v838_v12 = vsub.f32 %v2251_v40, %v830_v63 }
 0x430   : > { %v828_v2 = vpop.xlane.xlu1 %827 }
 0x431   : > { %v832_v4 = vmul.f32 0.03125, %v828_v2  ;;  %v833_v6 = vmul.f32 %v829_v1, %v829_v1  ;;  %v837_v14 = vsub.f32 %v2254_v42, %v829_v1  ;;  %v1082_v2 = vld [vmem:[#allocation10 + $0x18] sm:$0xff] }
 0x432   : > { %v826_v5 = vpop.xlane.xlu0 %825 }
 0x433   : > { %v836_v7 = vsub.f32 %v832_v4, %v834_v3  ;;  %v831_v8 = vmul.f32 0.03125, %v826_v5  ;;  %v1081_v3 = vld [vmem:[#allocation10 + $0x10] sm:$0xff]  ;;  %v1080_v4 = vld [vmem:[#allocation10 + $0x8] sm:$0xff]  ;;  %v1079_v5 = vld [vmem:[#allocation10] sm:$0xff] }
 0x435   : > { %v840_v9 = vadd.f32 1e-05, %v836_v7  ;;  %v835_v10 = vsub.f32 %v831_v8, %v833_v6 }
 0x437   : > { %1759 = vrsqrt.f32 %v840_v9  ;;  %v839_v11 = vadd.f32 1e-05, %v835_v10  ;;  %v1333_v9 = vld [vmem:[%s2340_s8 + $0x1] ss:$0 sm:$0xff] }
 0x439   : > { %1761 = vrsqrt.f32 %v839_v11 }
 0x444   : > { %v1760_v13 = vpop.eup %1759 }
 0x445   : > { %v844_v15 = vmul.f32 %v1760_v13, %v838_v12  ;;  %v1334_v13 = vld [vmem:[%s2342_s10] ss:$0 sm:$0xff] }
 0x446   : > { %v1762_v17 = vpop.eup %1761 }
 0x447   : > { %v843_v18 = vmul.f32 %v1762_v17, %v837_v14  ;;  %v854_v19 = vmul.f32 %v1327_v16, %v844_v15 }
 0x449   : > { %v853_v20 = vmul.f32 %v1327_v16, %v843_v18  ;;  %v864_v25 = vadd.f32 %v1329_v23, %v854_v19 }
 0x44b   : > { %v863_v24 = vadd.f32 %v1329_v23, %v853_v20 }
 0x44d   : > { %1587 = vmatprep.mubr.f32.mxu1 %v863_v24 }
 0x44e   : > { %1588 = vmatmul.mubr.f32.vlgmr.msra.gmra.mxu1 %v864_v25 }
 0x44f   : > { %1626 = vmatpush3.msra.mxu1 %v1094_v39 }
 0x450   : > { %1627 = vmatprep.subr.mxu1 %v1093_v41 }
 0x451   : > { %1628 = vmatpush3.msra.mxu1 %v1093_v41 }
 0x452   : > { %1629 = vmatprep.subr.mxu1 %v1092_v43 }
 0x453   : > { %1630 = vmatpush3.msra.mxu1 %v1092_v43 }
 0x454   : > { %1631 = vmatprep.subr.mxu1 %v1091_v44 }
 0x455   : > { %1632 = vmatpush3.msra.mxu1 %v1091_v44 }
 0x456   : > { %1633 = vmatprep.subr.mxu1 %v1090_v22 }
 0x457   : > { %1634 = vmatpush3.msra.mxu1 %v1090_v22 }
 0x458   : > { %1635 = vmatprep.subr.mxu1 %v1089_v45 }
 0x459   : > { %1636 = vmatpush3.msra.mxu1 %v1089_v45 }
 0x45a   : > { %1637 = vmatprep.subr.mxu1 %v1088_v21 }
 0x45b   : > { %1638 = vmatpush3.msra.mxu1 %v1088_v21 }
 0x45c   : > { %1639 = vmatprep.subr.mxu1 %v1087_v46 }
 0x45d   : > { %1640 = vmatpush3.msra.mxu1 %v1087_v46 }
 0x45e   : > { %1641 = vmatprep.subr.mxu1 %v1086_v47 }
 0x45f   : > { %1642 = vmatpush3.msra.mxu1 %v1086_v47 }
 0x460   : > { %1643 = vmatprep.subr.mxu1 %v1085_v48 }
 0x461   : > { %1644 = vmatpush3.msra.mxu1 %v1085_v48 }
 0x462   : > { %1645 = vmatprep.subr.mxu1 %v1084_v49 }
 0x463   : > { %1646 = vmatpush3.msra.mxu1 %v1084_v49 }
 0x464   : > { %1647 = vmatprep.subr.mxu1 %v1083_v50 }
 0x465   : > { %1648 = vmatpush3.msra.mxu1 %v1083_v50 }
 0x466   : > { %1649 = vmatprep.subr.mxu1 %v1082_v2 }
 0x467   : > { %1650 = vmatpush3.msra.mxu1 %v1082_v2 }
 0x468   : > { %1651 = vmatprep.subr.mxu1 %v1081_v3 }
 0x469   : > { %1652 = vmatpush3.msra.mxu1 %v1081_v3 }
 0x46a   : > { %1653 = vmatprep.subr.mxu1 %v1080_v4 }
 0x46b   : > { %1654 = vmatpush3.msra.mxu1 %v1080_v4 }
 0x46c   : > { %1655 = vmatprep.subr.mxu1 %v1079_v5 }
 0x46d   : > { %1656 = vmatpush3.msra.mxu1 %v1079_v5 }
 0x50e   : > { %v1589_v52 = vpop.f32.mrf.mxu1 }
 0x50f   : > { %v962_v53 = vadd.f32 %v1589_v52, %v1331_v51 }
 0x510   : > { %v956_v54 = vpop.f32.mrf.mxu1 }
 0x511   : > { %v968_v55 = vmul.f32 0.70710677, %v962_v53  ;;  %v957_v56 = vadd.f32 %v1331_v51, %v956_v54  ;;  %v966_v63 = vmul.f32 0.5, %v962_v53 }
 0x513   : > { %1763 = verf.f32 %v968_v55  ;;  %v967_v57 = vmul.f32 0.70710677, %v957_v56  ;;  %v965_v61 = vmul.f32 0.5, %v957_v56 }
 0x515   : > { %1765 = verf.f32 %v967_v57 }
 0x520   : > { %v1764_v58 = vpop.eup %1763 }
 0x521   : > { %v972_v60 = vadd.f32 1.0, %v1764_v58 }
 0x522   : > { %v1766_v59 = vpop.eup %1765 }
 0x523   : > { %v971_v62 = vadd.f32 1.0, %v1766_v59  ;;  %v974_v1 = vmul.f32 %v972_v60, %v966_v63 }
 0x525   : > { %v973_v0 = vmul.f32 %v971_v62, %v965_v61 }
 0x527   : > { %1622 = vmatprep.mubr.f32.mxu0 %v973_v0 }
 0x528   : > { %1623 = vmatmul.mubr.f32.vlgmr.msra.gmra.mxu0 %v974_v1 }
 0x5e8   : > { %v1624_v6 = vpop.f32.mrf.mxu0 }
 0x5e9   : > { %v1068_v7 = vadd.f32 %v1624_v6, %v2251_v40 }
 0x5ea   : > { %v1058_v8 = vpop.f32.mrf.mxu0 }
 0x5eb   : > { %v1067_v10 = vadd.f32 %v1058_v8, %v2254_v42  ;;  %v1078_v12 = vadd.f32 %v1333_v9, %v1068_v7 }
 0x5ed   : > { %v1077_v11 = vadd.f32 %v1333_v9, %v1067_v10 }
 0x5ef   : > { %1657 = vmatprep.mubr.f32.mxu1 %v1077_v11 }
 0x5f0   : > { %1658 = vmatmul.mubr.f32.vlgmr.msra.gmra.mxu1 %v1078_v12 }
 0x6b0   : > { %v1659_v40 = vpop.f32.mrf.mxu1 }
 0x6b1   : > { %v1174_v14 = vadd.f32 %v1659_v40, %v1334_v13 }
 0x6b2   : > { %v1168_v42 = vpop.f32.mrf.mxu1 }
 0x6b3   : > { %1178 = vst [vmem:[%s462_s12 + $0x8] sm:$0xff] %v1174_v14  ;;  %v1169_v15 = vadd.f32 %v1334_v13, %v1168_v42 }
 0x6b5   : > { %1177 = vst [vmem:[%s462_s12] sm:$0xff] %v1169_v15 }
 0x6b6   : > { %1912 = shalt.err (!%p1909_p5)
}
 0x6b7   : > { %s1913_s16 = scalar_lea.hbm %s2289_s5, 256  ;;  %s1917_s22 = scalar_lea.hbm %s2343_s11, 512 }
 0x6b8   : > { %p1914_p6 = scmp.ne.s32.totalorder %s2289_s5, %s1913_s16  ;;  %p1918_p9 = scmp.lt.s32.totalorder %s2289_s5, %s2343_s11 }
 0x6b9   : > { %p1919_p2 = scmp.lt.s32.totalorder %s1917_s22, %s1913_s16 }
 0x6ba   : > { %p1915_p4 = pnand %p1914_p6, %p2373_p12 }
 0x6bb   : > { %p1920_p3 = por %p1919_p2, %p1918_p9 }
 0x6bc   : > { %p1916_p8 = pneg %p1915_p4 }
 0x6be   : > { %p1921_p10 = pnand %p1920_p3, %p1916_p8 }
 0x6c0   : > { %1924 = shalt.err (!%p1921_p10)
}
 0x6c1   : > { %s1981_s29 = smov 128   ;;  %s1982_s13 = smov 8  }
 0x6c2   : > { %1678 = dma.vmem_to_hbm [thread:$0]  (%p2373_p12), %s2284_s15, 256, %s2289_s5, %s1180_s1, %s1981_s29, %s1981_s29, %s1982_s13  }
 0x6c3 PF: > { %s1208_s30 = sand.u32 1, %s1959_s17   ;;  %p2374_p7 = scmp.ne.s32.totalorder %s2355_s24, 0 }
 0x6c4   : > { %p2375_p1 = scmp.ge.s32.totalorder %s1971_s20, 2  ;;  %s1209_s21 = scalar_lea.sflag [#allocation4], %s1208_s30 }
 0x6c6   : > { %p1698_p13 = pnand %p2375_p1, %p2374_p7 }
 0x6c8   : > { %p1699_p0 = pneg %p1698_p13 }
 0x6ca   : > { %1954 = dma.done.wait (%p1699_p0), %s1209_s21, 256  }
 0x6cb   : > { %1956 = vsyncadd (%p1699_p0), %s1209_s21, 4294967040  ;;  %s2376_s23 = sld [smem:[#allocation16_spill]]  ;;  %p26_p11 = scmp.ge.s32.totalorder %s2143_s27, 4  }
 0x6cc   : > { %s2377_s17 = smov %s1963_s18  ;;  %s2378_s18 = smov %s1967_s19 }
 0x6cd   : > { %s2380_s20 = smov %s2143_s27  ;;  %28 = sbr.rel (!%p26_p11) target bundleno = 12 (0xc), region = 131 }
 0x6d1   : > { %s2379_s19 = smov %s2376_s23 }
 0x6d2   :  { %1214 = vsyncpa [#allocation3], 1 }
 0x6d3   :  { %1216 = vsyncpa [#allocation3 + $0x1], 1 }
 0x6d4   :  { %1217 = vsyncpa [#allocation6], 1 }
 0x6d5   :  { %1218 = vsyncpa [#allocation9], 1 }
 0x6d6   :  { %1219 = vsyncpa [#allocation4], 1 }
 0x6d7   :  { %1221 = vsyncpa [#allocation4 + $0x1], 1 }

// kernel: tpu_custom_call.1
= control target key start
LH: loop header
LB: loop body
LE: loop exit
PB: predicated region body
PF: predicated region fallthrough
CT: control target
= control target key end

     0   :  { %s2332_s0 = inlined_call_operand.hbm [shape: f32[32,128], index: 0, kind: input, shape index: {}]   ;;  %s2333_s1 = inlined_call_operand.hbm [shape: f32[128,128], index: 1, kind: input, shape index: {}]   ;;  %s2334_s2 = inlined_call_operand.vmem [shape: f32[1,128], index: 2, kind: input, shape index: {}]   ;;  %s2335_s3 = inlined_call_operand.vmem [shape: f32[2,1,128], index: 3, kind: input, shape index: {}]   ;;  %s2336_s4 = inlined_call_operand.vmem [shape: f32[2,1,128], index: 4, kind: input, shape index: {}]   ;;  %s2337_s5 = inlined_call_operand.hbm [shape: f32[2,128,128], index: 5, kind: input, shape index: {}]   ;;  %s2338_s6 = inlined_call_operand.vmem [shape: f32[2,1,128], index: 6, kind: input, shape index: {}]   ;;  %s2339_s7 = inlined_call_operand.hbm [shape: f32[2,128,128], index: 7, kind: input, shape index: {}]   ;;  %s2340_s8 = inlined_call_operand.vmem [shape: f32[2,1,128], index: 8, kind: input, shape index: {}]   ;;  %s2341_s9 = inlined_call_operand.hbm [shape: f32[128,128], index: 9, kind: input, shape index: {}]   ;;  %s2342_s10 = inlined_call_operand.vmem [shape: f32[1,128], index: 10, kind: input, shape index: {}]   ;;  %s2343_s11 = inlined_call_operand.hbm [shape: f32[32,128], index: 11, kind: output, shape index: {}]  }
   0x1   :  { %2350 = sst [smem:[#allocation17_spill]] %s2333_s1 }
   0x2   :  { %2351 = sst [smem:[#allocation18_spill]] %s2337_s5 }
   0x3   :  { %2352 = sst [smem:[#allocation19_spill]] %s2339_s7 }
   0x4   :  { %2353 = sst [smem:[#allocation20_spill]] %s2341_s9 }
   0x5   :  { %16 = vsyncpa [#allocation3], 0 }
   0x6   :  { %18 = vsyncpa [#allocation3 + $0x1], 0 }
   0x7   :  { %19 = vsyncpa [#allocation6], 0 }
   0x8   :  { %20 = vsyncpa [#allocation9], 0 }
   0x9   :  { %21 = vsyncpa [#allocation4], 0 }
   0xa   :  { %23 = vsyncpa [#allocation4 + $0x1], 0  ;;  %s2043_s17 = smov 0   ;;  %s2045_s18 = smov 0  }
   0xb   :  { %s2047_s19 = smov 0   ;;  %s2049_s20 = smov 0  }
   0xc LB: > { %s2064_s21 = sadd.s32 4294967295, %s1971_s20   ;;  %s1304_s22 = sadd.s32 4294967294, %s1971_s20   ;;  %s1971_s20 = sphi %s2049_s20, %s2380_s20   ;;  %s1967_s19 = sphi %s2047_s19, %s2379_s19   ;;  %s1963_s18 = sphi %s2045_s18, %s2378_s18   ;;  %s1959_s17 = sphi %s2043_s17, %s2377_s17  }
   0xd   : > { %p49_p0 = scmp.ne.s32.totalorder %s1963_s18, %s1959_s17  ;;  %p2344_p1 = scmp.eq.s32.totalorder %s2064_s21, 0 }
   0xe   : > { %p283_p2 = scmp.eq.s32.totalorder %s2064_s21, 1  ;;  %p289_p3 = scmp.eq.s32.totalorder %s1304_s22, 1 }
   0xf   : > { %p2073_p4 = por %p2344_p1, %p49_p0  ;;  %p1305_p5 = scmp.ge.s32.totalorder %s1971_s20, 1 }
  0x10   : > { %p2078_p6 = por %p289_p3, %p49_p0  ;;  %p296_p7 = scmp.lt.s32.totalorder %s1971_s20, 3 }
  0x11   : > { %s2354_s23 = scalar_select %p2073_p4, 1, 0 }
  0x12   : > { %s2355_s24 = scalar_select %p2078_p6, 1, 0 }
  0x13   : > { %p2083_p8 = pnand %p1305_p5, %p296_p7  ;;  %s1973_s26 = smov [#allocation5]  }
  0x14   : > { %s308_s27 = sshll.u32 %s1973_s26, 4  ;;  %s1974_s29 = smov [#allocation8]   ;;  %s309_s27 = int_to_ptr.vmem [resolvable:$true] %s308_s27 }
  0x15   : > { %s2356_s25 = scalar_select %p2083_p8, 1, 0 }
  0x16   : > { %p1680_p9 = pneg %p2083_p8  ;;  %s346_s30 = sshll.u32 %s1974_s29, 4  ;;  %s347_s30 = int_to_ptr.vmem [resolvable:$true] %s346_s30 }
  0x17   : > { %s1975_s12 = smov [#allocation7]   ;;  %s1778_s14 = scalar_lea.vmem %s309_s27, 2048 }
  0x18   : > { %p2092_p11 = pnand %p1680_p9, %p2344_p1  ;;  %s330_s13 = sshll.u32 %s1975_s12, 4  ;;  %s331_s13 = int_to_ptr.vmem [resolvable:$true] %s330_s13 }
  0x19   : > { %p1779_p13 = scmp.ne.s32.totalorder %s309_s27, %s1778_s14  ;;  %p1786_p5 = scmp.lt.s32.totalorder %s309_s27, %s309_s27 }
  0x1a   : > { %p1769_p12 = pneg %p2092_p11  ;;  %p1787_p7 = scmp.lt.s32.totalorder %s1778_s14, %s1778_s14 }
  0x1c   : > { %p1781_p0 = pnand %p1779_p13, %p1769_p12  ;;  %p1788_p9 = por %p1787_p7, %p1786_p5 }
  0x1e   : > { %p1782_p3 = pneg %p1781_p0 }
  0x20   : > { %p1789_p10 = pnand %p1788_p9, %p1782_p3 }
  0x22   : > { %1792 = shalt.err (!%p1789_p10)
}
  0x23   : > { %s2345_s15 = smov 128   ;;  %s2346_s16 = smov 8  }
  0x24   : > { %s2358_s1 = sld [smem:[#allocation17_spill]]  ;;  %s1804_s29 = scalar_lea.vmem %s347_s30, 4096 }
  0x25   : > { %p1805_p13 = scmp.ne.s32.totalorder %s347_s30, %s1804_s29  ;;  %p1812_p3 = scmp.lt.s32.totalorder %s347_s30, %s347_s30 }
  0x26   : > { %p1813_p10 = scmp.lt.s32.totalorder %s1804_s29, %s1804_s29 }
  0x27   : > { %p1807_p0 = pnand %p1805_p13, %p1769_p12 }
  0x28   : > { %p1814_p7 = por %p1813_p10, %p1812_p3 }
  0x29   : > { %p1808_p5 = pneg %p1807_p0 }
  0x2a   : > { %1683 = dma.hbm_to_vmem [thread:$0]  (!%p2092_p11), %s2358_s1, 2048, %s309_s27, [#allocation6], %s2345_s15, %s2345_s15, %s2346_s16  }
  0x2b   : > { %p1815_p9 = pnand %p1814_p7, %p1808_p5 }
  0x2d   : > { %1818 = shalt.err (!%p1815_p9)
}
  0x2e   : > { %s2359_s7 = sld [smem:[#allocation19_spill]]  ;;  %s1830_s27 = scalar_lea.vmem %s331_s13, 4096 }
  0x2f   : > { %p1831_p1 = scmp.ne.s32.totalorder %s331_s13, %s1830_s27  ;;  %p1838_p3 = scmp.lt.s32.totalorder %s331_s13, %s331_s13 }
  0x30   : > { %p1839_p5 = scmp.lt.s32.totalorder %s1830_s27, %s1830_s27 }
  0x31   : > { %p1833_p13 = pnand %p1831_p1, %p1769_p12 }
  0x32   : > { %p1840_p10 = por %p1839_p5, %p1838_p3 }
  0x33   : > { %p1834_p0 = pneg %p1833_p13 }
  0x34   : > { %1689 = dma.hbm_to_vmem [thread:$0]  (!%p2092_p11), %s2359_s7, 4096, %s347_s30, [#allocation9], %s2345_s15, %s2345_s15, %s2346_s16  }
  0x35   : > { %p1841_p7 = pnand %p1840_p10, %p1834_p0 }
  0x37   : > { %1844 = shalt.err (!%p1841_p7)
}
  0x38   : > { %s2360_s5 = sld [smem:[#allocation18_spill]]  ;;  %s1978_s30 = smov [#allocation10]  }
  0x39   : > { %s362_s29 = sshll.u32 %s1978_s30, 4  ;;  %s363_s29 = int_to_ptr.vmem [resolvable:$true] %s362_s29 }
  0x3a   : > { %s1856_s12 = scalar_lea.vmem %s363_s29, 2048  ;;  %p1864_p0 = scmp.lt.s32.totalorder %s363_s29, %s363_s29 }
  0x3b   : > { %p1857_p1 = scmp.ne.s32.totalorder %s363_s29, %s1856_s12  ;;  %p1865_p3 = scmp.lt.s32.totalorder %s1856_s12, %s1856_s12 }
  0x3d   : > { %p1859_p9 = pnand %p1857_p1, %p1769_p12  ;;  %p1866_p5 = por %p1865_p3, %p1864_p0 }
  0x3e   : > { %1686 = dma.hbm_to_vmem [thread:$0]  (!%p2092_p11), %s2360_s5, 4096, %s331_s13, [#allocation6], %s2345_s15, %s2345_s15, %s2346_s16  }
  0x3f   : > { %p1860_p13 = pneg %p1859_p9 }
  0x41   : > { %p1867_p10 = pnand %p1866_p5, %p1860_p13 }
  0x43   : > { %1870 = shalt.err (!%p1867_p10)
}
  0x44   : > { %s2361_s9 = sld [smem:[#allocation20_spill]]  ;;  %s2143_s27 = sadd.s32 1, %s1971_s20  }
  0x45   : > { %s36_s28 = sadd.s32 1, %s1967_s19  ;;  %s33_s22 = ssub.s32 %s1971_s20, %s2143_s27 }
  0x46   : > { %p43_p12 = scmp.ne.s32.totalorder %s1967_s19, %s1963_s18  ;;  %p34_p7 = scmp.eq.s32.totalorder %s33_s22, 0 }
  0x47   : > { %p44_p1 = scmp.eq.s32.totalorder %s1971_s20, 0  ;;  %p1705_p13 = scmp.lt.s32.totalorder %s1971_s20, 2 }
  0x48   : > { %p2153_p9 = por %p283_p2, %p43_p12  ;;  %s379_s12 = sand.u32 1, %s1967_s19  }
  0x49   : > { %s2159_s30 = scalar_select %p34_p7, %s1967_s19, %s36_s28  }
  0x4a   : > { %1692 = dma.hbm_to_vmem [thread:$0]  (!%p2092_p11), %s2361_s9, 2048, %s363_s29, [#allocation9], %s2345_s15, %s2345_s15, %s2346_s16  }
  0x4b   : > { %s2362_s26 = scalar_select %p2153_p9, 1, 0 }
  0x4c   : > { %2363 = sst [smem:[#allocation16_spill]] %s2159_s30  ;;  %p45_p0 = por %p44_p1, %p43_p12 }
  0x4d   : > { %s1311_s13 = sshll.u32 %s379_s12, 4  ;;  %s1340_s29 = sshll.u32 %s1971_s20, 8 }
  0x4e   : > { %s2166_s16 = scalar_lea.hbm %s2332_s0, %s1340_s29  ;;  %s383_s22 = scalar_lea.vmem [#allocation2], %s1311_s13 }
  0x4f   : > { %s390_s1 = sshll.u32 %s383_s22, 4  ;;  %p2170_p2 = pnand %p1705_p13, %p45_p0  ;;  %s2168_s1 = int_to_ptr.vmem [resolvable:$true] %s390_s1 }
  0x50   : > { %s2174_s28 = scalar_lea.sflag [#allocation3], %s379_s12  ;;  %s1871_s7 = scalar_lea.hbm %s2166_s16, 256 }
  0x51   : > { %p1872_p11 = scmp.ne.s32.totalorder %s2166_s16, %s1871_s7  ;;  %p1873_p3 = pneg %p2170_p2 }
  0x52   : > { %s1876_s13 = scalar_lea.hbm %s2332_s0, 512  ;;  %p1877_p12 = scmp.lt.s32.totalorder %s2166_s16, %s2332_s0 }
  0x53   : > { %p1874_p5 = pnand %p1873_p3, %p1872_p11  ;;  %p1878_p7 = scmp.lt.s32.totalorder %s1876_s13, %s1871_s7 }
  0x55   : > { %p1875_p10 = pneg %p1874_p5  ;;  %p1879_p1 = por %p1878_p7, %p1877_p12 }
  0x57   : > { %p1880_p13 = pnand %p1879_p1, %p1875_p10 }
  0x59   : > { %1883 = shalt.err (!%p1880_p13)
}
  0x5a   : > { %s1884_s12 = scalar_lea.vmem %s2168_s1, 256  ;;  %s1979_s9 = smov [#allocation2]  }
  0x5b   : > { %p1885_p0 = scmp.ne.s32.totalorder %s2168_s1, %s1884_s12  ;;  %s1889_s30 = sshll.u32 %s1979_s9, 4  ;;  %s1890_s30 = int_to_ptr.vmem [resolvable:$false] %s1889_s30 }
  0x5c   : > { %s1891_s15 = scalar_lea.vmem %s1890_s30, 512  ;;  %p1892_p5 = scmp.lt.s32.totalorder %s2168_s1, %s1890_s30 }
  0x5d   : > { %p1887_p6 = pnand %p1885_p0, %p1873_p3  ;;  %p1893_p9 = scmp.lt.s32.totalorder %s1891_s15, %s1884_s12 }
  0x5f   : > { %p1888_p11 = pneg %p1887_p6  ;;  %p1894_p4 = por %p1893_p9, %p1892_p5 }
  0x61   : > { %p1895_p8 = pnand %p1894_p4, %p1888_p11 }
  0x63   : > { %1898 = shalt.err (!%p1895_p8)
}
  0x64   : > { %s2365_s7 = smov 8   ;;  %s2366_s29 = smov 128  }
  0x65   : > { %1696 = dma.hbm_to_vmem [thread:$0]  (!%p2170_p2), %s2166_s16, 256, %s2168_s1, %s2174_s28, %s2366_s29, %s2366_s29, %s2365_s7  }
  0x66   : > { %p2367_p6 = scmp.ne.s32.totalorder %s2356_s25, 0 }
  0x67   : > { %s2201_s9 = sand.u32 (!%p2367_p6), 1, %s1963_s18   ;;  %p2368_p4 = scmp.ne.s32.totalorder (!%p2367_p6), %s2354_s23, 0 }
  0x68   : > { %402 = sbr.rel (%p2367_p6) target bundleno = 1731 (0x6c3), region = 64  ;;  %s1315_s30 = sshll.u32 (!%p2367_p6), %s2201_s9, 4 }
  0x69   : > { %s405_s13 = scalar_lea.sflag (!%p2367_p6), [#allocation3], %s2201_s9  ;;  %s2207_s5 = scalar_lea.vmem (!%p2367_p6), [#allocation2], %s1315_s30 }
  0x6d   : > { %1942 = dma.done.wait (%p2368_p4), %s405_s13, 256  }
  0x6e   : > { %1944 = vsyncadd (%p2368_p4), %s405_s13, 4294967040  ;;  %p2369_p8 = scmp.eq.s32.totalorder %s2064_s21, 0 }
  0x70   : > { %1946 = dma.done.wait (%p2369_p8), [#allocation6], 6144   ;;  %p2370_p9 = pmov %p2369_p8 }
  0x71   : > { %p2371_p2 = pmov %p2369_p8 }
  0x72   : > { %1948 = vsyncadd (%p2370_p9), [#allocation6], 4294961152 }
  0x73   : > { %1950 = dma.done.wait (%p2371_p2), [#allocation9], 6144   ;;  %p2372_p3 = pmov %p2371_p2 }
  0x74   : > { %v482_v0 = vld [vmem:[#allocation5 + $0x78] sm:$0xff]  ;;  %v481_v1 = vld [vmem:[#allocation5 + $0x70] sm:$0xff]  ;;  %v480_v2 = vld [vmem:[#allocation5 + $0x68] sm:$0xff]  ;;  %s462_s12 = scalar_lea.vmem [#allocation11], %s1315_s30  ;;  %s1341_s7 = sshll.u32 %s2064_s21, 8 }
  0x75   : > { %1952 = vsyncadd (%p2372_p3), [#allocation9], 4294961152  ;;  %1450 = vmatprep.subr.mxu0 %v482_v0  ;;  %v479_v3 = vld [vmem:[#allocation5 + $0x60] sm:$0xff]  ;;  %v478_v5 = vld [vmem:[#allocation5 + $0x58] sm:$0xff]  ;;  %s1193_s15 = sshll.u32 %s462_s12, 4  ;;  %s1180_s1 = scalar_lea.sflag [#allocation4], %s2201_s9  ;;  %s2284_s15 = int_to_ptr.vmem [resolvable:$true] %s1193_s15 }
  0x76   : > { %1451 = vmatpush3.msra.mxu0 %v482_v0  ;;  %v465_v4 = vld [vmem:[%s2207_s5] sm:$0xff]  ;;  %v476_v7 = vld [vmem:[#allocation5 + $0x48] sm:$0xff]  ;;  %v474_v9 = vld [vmem:[#allocation5 + $0x38] sm:$0xff]  ;;  %s1899_s30 = scalar_lea.vmem %s2284_s15, 256  ;;  %p2373_p12 = scmp.ne.s32.totalorder %s2362_s26, 0 }
  0x77   : > { %1452 = vmatprep.subr.mxu0 %v481_v1  ;;  %1482 = vmatprep.mubr.f32.mxu0 %v465_v4  ;;  %v477_v6 = vld [vmem:[#allocation5 + $0x50] sm:$0xff]  ;;  %v475_v8 = vld [vmem:[#allocation5 + $0x40] sm:$0xff]  ;;  %v472_v11 = vld [vmem:[#allocation5 + $0x28] sm:$0xff]  ;;  %p1900_p10 = scmp.ne.s32.totalorder %s2284_s15, %s1899_s30  ;;  %s1980_s21 = smov [#allocation11]  }
  0x78   : > { %1453 = vmatpush3.msra.mxu0 %v481_v1  ;;  %v473_v10 = vld [vmem:[#allocation5 + $0x30] sm:$0xff]  ;;  %v471_v12 = vld [vmem:[#allocation5 + $0x20] sm:$0xff]  ;;  %v470_v13 = vld [vmem:[#allocation5 + $0x18] sm:$0xff]  ;;  %s1903_s23 = sshll.u32 %s1980_s21, 4  ;;  %s1904_s23 = int_to_ptr.vmem [resolvable:$false] %s1903_s23 }
  0x79   : > { %1454 = vmatprep.subr.mxu0 %v480_v2  ;;  %v469_v14 = vld [vmem:[#allocation5 + $0x10] sm:$0xff]  ;;  %v468_v15 = vld [vmem:[#allocation5 + $0x8] sm:$0xff]  ;;  %v467_v16 = vld [vmem:[#allocation5] sm:$0xff]  ;;  %p1901_p7 = pnand %p1900_p10, %p2373_p12  ;;  %s1905_s25 = scalar_lea.vmem %s1904_s23, 512 }
  0x7a   : > { %1455 = vmatpush3.msra.mxu0 %v480_v2  ;;  %v466_v17 = vld [vmem:[%s2207_s5 + $0x8] sm:$0xff]  ;;  %v1321_v19 = vld [vmem:[%s2334_s2] ss:$0 sm:$0xff]  ;;  %v623_v26 = vld [vmem:[#allocation7 + $0x70] sm:$0xff]  ;;  %s2289_s5 = scalar_lea.hbm %s2343_s11, %s1341_s7  ;;  %p1906_p13 = scmp.lt.s32.totalorder %s2284_s15, %s1904_s23 }
  0x7b   : > { %1456 = vmatprep.subr.mxu0 %v479_v3  ;;  %v624_v25 = vld [vmem:[#allocation7 + $0x78] sm:$0xff]  ;;  %v622_v27 = vld [vmem:[#allocation7 + $0x68] sm:$0xff]  ;;  %v621_v28 = vld [vmem:[#allocation7 + $0x60] sm:$0xff]  ;;  %p1902_p1 = pneg %p1901_p7  ;;  %p1907_p0 = scmp.lt.s32.totalorder %s1905_s25, %s1899_s30 }
  0x7c   : > { %1457 = vmatpush3.msra.mxu0 %v479_v3  ;;  %1485 = vmatprep.subr.mxu1 %v624_v25  ;;  %v620_v29 = vld [vmem:[#allocation7 + $0x58] sm:$0xff]  ;;  %v619_v30 = vld [vmem:[#allocation7 + $0x50] sm:$0xff]  ;;  %v618_v31 = vld [vmem:[#allocation7 + $0x48] sm:$0xff] }
  0x7d   : > { %1458 = vmatprep.subr.mxu0 %v478_v5  ;;  %1486 = vmatpush3.msra.mxu1 %v624_v25  ;;  %v617_v32 = vld [vmem:[#allocation7 + $0x40] sm:$0xff]  ;;  %v616_v33 = vld [vmem:[#allocation7 + $0x38] sm:$0xff]  ;;  %v615_v34 = vld [vmem:[#allocation7 + $0x30] sm:$0xff]  ;;  %p1908_p11 = por %p1907_p0, %p1906_p13 }
  0x7e   : > { %1459 = vmatpush3.msra.mxu0 %v478_v5  ;;  %1487 = vmatprep.subr.mxu1 %v623_v26  ;;  %v614_v35 = vld [vmem:[#allocation7 + $0x28] sm:$0xff]  ;;  %v613_v36 = vld [vmem:[#allocation7 + $0x20] sm:$0xff]  ;;  %v612_v37 = vld [vmem:[#allocation7 + $0x18] sm:$0xff] }
  0x7f   : > { %1460 = vmatprep.subr.mxu0 %v477_v6  ;;  %1488 = vmatpush3.msra.mxu1 %v623_v26  ;;  %v611_v38 = vld [vmem:[#allocation7 + $0x10] sm:$0xff]  ;;  %v610_v39 = vld [vmem:[#allocation7 + $0x8] sm:$0xff]  ;;  %v609_v40 = vld [vmem:[#allocation7] sm:$0xff]  ;;  %p1909_p5 = pnand %p1908_p11, %p1902_p1 }
  0x80   : > { %1461 = vmatpush3.msra.mxu0 %v477_v6  ;;  %1489 = vmatprep.subr.mxu1 %v622_v27  ;;  %v732_v41 = vld [vmem:[#allocation8 + $0x78] sm:$0xff]  ;;  %v731_v42 = vld [vmem:[#allocation8 + $0x70] sm:$0xff]  ;;  %v730_v43 = vld [vmem:[#allocation8 + $0x68] sm:$0xff] }
  0x81   : > { %1462 = vmatprep.subr.mxu0 %v476_v7  ;;  %1490 = vmatpush3.msra.mxu1 %v622_v27  ;;  %v1322_v60 = vld [vmem:[%s2335_s3] ss:$0 sm:$0xff] }
  0x82   : > { %1463 = vmatpush3.msra.mxu0 %v476_v7  ;;  %1491 = vmatprep.subr.mxu1 %v621_v28  ;;  %v1323_v62 = vld [vmem:[%s2336_s4] ss:$0 sm:$0xff]  ;;  %v728_v7 = vld [vmem:[#allocation8 + $0x58] sm:$0xff] }
  0x83   : > { %1464 = vmatprep.subr.mxu0 %v475_v8  ;;  %1492 = vmatpush3.msra.mxu1 %v621_v28  ;;  %v729_v6 = vld [vmem:[#allocation8 + $0x60] sm:$0xff] }
  0x84   : > { %1465 = vmatpush3.msra.mxu0 %v475_v8  ;;  %1493 = vmatprep.subr.mxu1 %v620_v29  ;;  %v727_v8 = vld [vmem:[#allocation8 + $0x50] sm:$0xff] }
  0x85   : > { %1466 = vmatprep.subr.mxu0 %v474_v9  ;;  %1494 = vmatpush3.msra.mxu1 %v620_v29 }
  0x86   : > { %1467 = vmatpush3.msra.mxu0 %v474_v9  ;;  %1495 = vmatprep.subr.mxu1 %v619_v30  ;;  %v726_v9 = vld [vmem:[#allocation8 + $0x48] sm:$0xff] }
  0x87   : > { %1468 = vmatprep.subr.mxu0 %v473_v10  ;;  %1496 = vmatpush3.msra.mxu1 %v619_v30 }
  0x88   : > { %1469 = vmatpush3.msra.mxu0 %v473_v10  ;;  %1497 = vmatprep.subr.mxu1 %v618_v31  ;;  %v725_v10 = vld [vmem:[#allocation8 + $0x40] sm:$0xff] }
  0x89   : > { %1470 = vmatprep.subr.mxu0 %v472_v11  ;;  %1498 = vmatpush3.msra.mxu1 %v618_v31 }
  0x8a   : > { %1471 = vmatpush3.msra.mxu0 %v472_v11  ;;  %1499 = vmatprep.subr.mxu1 %v617_v32  ;;  %v724_v11 = vld [vmem:[#allocation8 + $0x38] sm:$0xff] }
  0x8b   : > { %1472 = vmatprep.subr.mxu0 %v471_v12  ;;  %1500 = vmatpush3.msra.mxu1 %v617_v32 }
  0x8c   : > { %1473 = vmatpush3.msra.mxu0 %v471_v12  ;;  %1501 = vmatprep.subr.mxu1 %v616_v33  ;;  %v723_v12 = vld [vmem:[#allocation8 + $0x30] sm:$0xff] }
  0x8d   : > { %1474 = vmatprep.subr.mxu0 %v470_v13  ;;  %1502 = vmatpush3.msra.mxu1 %v616_v33 }
  0x8e   : > { %1475 = vmatpush3.msra.mxu0 %v470_v13  ;;  %1503 = vmatprep.subr.mxu1 %v615_v34  ;;  %v722_v13 = vld [vmem:[#allocation8 + $0x28] sm:$0xff] }
  0x8f   : > { %1476 = vmatprep.subr.mxu0 %v469_v14  ;;  %1504 = vmatpush3.msra.mxu1 %v615_v34 }
  0x90   : > { %1477 = vmatpush3.msra.mxu0 %v469_v14  ;;  %1505 = vmatprep.subr.mxu1 %v614_v35  ;;  %v721_v14 = vld [vmem:[#allocation8 + $0x20] sm:$0xff] }
  0x91   : > { %1478 = vmatprep.subr.mxu0 %v468_v15  ;;  %1506 = vmatpush3.msra.mxu1 %v614_v35 }
  0x92   : > { %1479 = vmatpush3.msra.mxu0 %v468_v15  ;;  %1507 = vmatprep.subr.mxu1 %v613_v36  ;;  %v720_v15 = vld [vmem:[#allocation8 + $0x18] sm:$0xff] }
  0x93   : > { %1480 = vmatprep.subr.mxu0 %v467_v16  ;;  %1508 = vmatpush3.msra.mxu1 %v613_v36 }
  0x94   : > { %1481 = vmatpush3.msra.mxu0 %v467_v16  ;;  %1509 = vmatprep.subr.mxu1 %v612_v37  ;;  %v719_v16 = vld [vmem:[#allocation8 + $0x10] sm:$0xff] }
  0x95   : > { %1483 = vmatmul.mubr.f32.vlgmr.msra.gmra.mxu0 %v466_v17  ;;  %1510 = vmatpush3.msra.mxu1 %v612_v37  ;;  %v718_v17 = vld [vmem:[#allocation8 + $0x8] sm:$0xff]  ;;  %v1325_v37 = vld [vmem:[%s2340_s8] ss:$0 sm:$0xff] }
  0x96   : > { %1511 = vmatprep.subr.mxu1 %v611_v38  ;;  %1520 = vmatprep.subr.mxu0 %v732_v41 }
  0x97   : > { %1512 = vmatpush3.msra.mxu1 %v611_v38  ;;  %1521 = vmatpush3.msra.mxu0 %v732_v41 }
  0x98   : > { %1513 = vmatprep.subr.mxu1 %v610_v39  ;;  %1522 = vmatprep.subr.mxu0 %v731_v42 }
  0x99   : > { %1514 = vmatpush3.msra.mxu1 %v610_v39  ;;  %1523 = vmatpush3.msra.mxu0 %v731_v42 }
  0x9a   : > { %1515 = vmatprep.subr.mxu1 %v609_v40  ;;  %1524 = vmatprep.subr.mxu0 %v730_v43 }
  0x9b   : > { %1516 = vmatpush3.msra.mxu1 %v609_v40  ;;  %1525 = vmatpush3.msra.mxu0 %v730_v43 }
  0x9c   : > { %1526 = vmatprep.subr.mxu0 %v729_v6 }
  0x9d   : > { %1527 = vmatpush3.msra.mxu0 %v729_v6 }
  0x9e   : > { %1528 = vmatprep.subr.mxu0 %v728_v7 }
  0x9f   : > { %1529 = vmatpush3.msra.mxu0 %v728_v7 }
  0xa0   : > { %1530 = vmatprep.subr.mxu0 %v727_v8 }
  0xa1   : > { %1531 = vmatpush3.msra.mxu0 %v727_v8 }
  0xa2   : > { %1532 = vmatprep.subr.mxu0 %v726_v9 }
  0xa3   : > { %1533 = vmatpush3.msra.mxu0 %v726_v9 }
  0xa4   : > { %1534 = vmatprep.subr.mxu0 %v725_v10 }
  0xa5   : > { %1535 = vmatpush3.msra.mxu0 %v725_v10 }
  0xa6   : > { %1536 = vmatprep.subr.mxu0 %v724_v11 }
  0xa7   : > { %1537 = vmatpush3.msra.mxu0 %v724_v11 }
  0xa8   : > { %1538 = vmatprep.subr.mxu0 %v723_v12 }
  0xa9   : > { %1539 = vmatpush3.msra.mxu0 %v723_v12 }
  0xaa   : > { %1540 = vmatprep.subr.mxu0 %v722_v13 }
  0xab   : > { %1541 = vmatpush3.msra.mxu0 %v722_v13 }
  0xac   : > { %1542 = vmatprep.subr.mxu0 %v721_v14 }
  0xad   : > { %1543 = vmatpush3.msra.mxu0 %v721_v14 }
  0xae   : > { %1544 = vmatprep.subr.mxu0 %v720_v15 }
  0xaf   : > { %1545 = vmatpush3.msra.mxu0 %v720_v15 }
  0xb0   : > { %1546 = vmatprep.subr.mxu0 %v719_v16 }
  0xb1   : > { %1547 = vmatpush3.msra.mxu0 %v719_v16  ;;  %v1327_v16 = vld [vmem:[%s2335_s3 + $0x1] ss:$0 sm:$0xff] }
  0xb2   : > { %1548 = vmatprep.subr.mxu0 %v718_v17 }
  0xb3   : > { %1549 = vmatpush3.msra.mxu0 %v718_v17 }
 0x155   : > { %v1484_v18 = vpop.f32.mrf.mxu0 }
 0x156   : > { %v2228_v22 = vadd.f32 %v1484_v18, %v1321_v19  ;;  %v717_v18 = vld [vmem:[#allocation8] sm:$0xff] }
 0x157   : > { %v556_v20 = vpop.f32.mrf.mxu0  ;;  %1550 = vmatprep.subr.mxu0 %v717_v18 }
 0x158   : > { %v2226_v21 = vadd.f32 %v1321_v19, %v556_v20  ;;  %v570_v24 = vmul.f32 %v2228_v22, %v2228_v22  ;;  %1551 = vmatpush3.msra.mxu0 %v717_v18  ;;  %v1324_v19 = vld [vmem:[%s2338_s6] ss:$0 sm:$0xff] }
 0x15a   : > { %565 = vadd.xlane.f32.xlu0 %v2226_v21  ;;  %v569_v23 = vmul.f32 %v2226_v21, %v2226_v21 }
 0x15c   : > { %571 = vadd.xlane.f32.xlu1 %v569_v23 }
 0x15e   : > { %567 = vadd.xlane.f32.xlu0 %v2228_v22 }
 0x160   : > { %573 = vadd.xlane.f32.xlu1 %v570_v24 }
 0x1e3   : > { %v566_v44 = vpop.xlane.xlu0 %565 }
 0x1e4   : > { %v575_v45 = vmul.f32 0.03125, %v566_v44 }
 0x1e5   : > { %v572_v46 = vpop.xlane.xlu1 %571 }
 0x1e6   : > { %v579_v47 = vmul.f32 %v575_v45, %v575_v45  ;;  %v577_v48 = vmul.f32 0.03125, %v572_v46  ;;  %v583_v58 = vsub.f32 %v2226_v21, %v575_v45  ;;  %v880_v45 = vld [vmem:[#allocation7 + $0xf0] sm:$0xff]  ;;  %v878_v46 = vld [vmem:[#allocation7 + $0xe0] sm:$0xff] }
 0x1e7   : > { %v568_v49 = vpop.xlane.xlu0 %567 }
 0x1e8   : > { %v581_v50 = vsub.f32 %v577_v48, %v579_v47  ;;  %v576_v51 = vmul.f32 0.03125, %v568_v49  ;;  %v877_v47 = vld [vmem:[#allocation7 + $0xd8] sm:$0xff]  ;;  %v876_v48 = vld [vmem:[#allocation7 + $0xd0] sm:$0xff]  ;;  %v875_v49 = vld [vmem:[#allocation7 + $0xc8] sm:$0xff] }
 0x1e9   : > { %v574_v52 = vpop.xlane.xlu1 %573 }
 0x1ea   : > { %v585_v53 = vadd.f32 1e-05, %v581_v50  ;;  %v580_v54 = vmul.f32 %v576_v51, %v576_v51  ;;  %v578_v55 = vmul.f32 0.03125, %v574_v52  ;;  %v584_v63 = vsub.f32 %v2228_v22, %v576_v51  ;;  %v874_v50 = vld [vmem:[#allocation7 + $0xc0] sm:$0xff]  ;;  %v873_v51 = vld [vmem:[#allocation7 + $0xb8] sm:$0xff]  ;;  %v872_v52 = vld [vmem:[#allocation7 + $0xb0] sm:$0xff] }
 0x1ec   : > { %1751 = vrsqrt.f32 %v585_v53  ;;  %v582_v56 = vsub.f32 %v578_v55, %v580_v54  ;;  %v871_v53 = vld [vmem:[#allocation7 + $0xa8] sm:$0xff]  ;;  %v870_v54 = vld [vmem:[#allocation7 + $0xa0] sm:$0xff]  ;;  %v869_v55 = vld [vmem:[#allocation7 + $0x98] sm:$0xff] }
 0x1ee   : > { %v586_v57 = vadd.f32 1e-05, %v582_v56  ;;  %v868_v56 = vld [vmem:[#allocation7 + $0x90] sm:$0xff] }
 0x1f0   : > { %1753 = vrsqrt.f32 %v586_v57  ;;  %v867_v57 = vld [vmem:[#allocation7 + $0x88] sm:$0xff] }
 0x1f9   : > { %v1752_v59 = vpop.eup %1751 }
 0x1fa   : > { %v589_v61 = vmul.f32 %v1752_v59, %v583_v58  ;;  %v866_v58 = vld [vmem:[#allocation7 + $0x80] sm:$0xff]  ;;  %v991_v59 = vld [vmem:[#allocation8 + $0xf8] sm:$0xff] }
 0x1fb   : > { %1590 = vmatprep.subr.mxu0 %v991_v59 }
 0x1fc   : > { %v598_v0 = vmul.f32 %v1322_v60, %v589_v61  ;;  %v989_v61 = vld [vmem:[#allocation8 + $0xe8] sm:$0xff] }
 0x1fd   : > { %v1754_v1 = vpop.eup %1753 }
 0x1fe   : > { %v590_v2 = vmul.f32 %v1754_v1, %v584_v63  ;;  %v607_v3 = vadd.f32 %v1323_v62, %v598_v0 }
 0x200   : > { %v599_v4 = vmul.f32 %v1322_v60, %v590_v2  ;;  %1517 = vmatprep.mubr.f32.mxu1 %v607_v3  ;;  %v990_v60 = vld [vmem:[#allocation8 + $0xf0] sm:$0xff] }
 0x202   : > { %v608_v5 = vadd.f32 %v1323_v62, %v599_v4 }
 0x204   : > { %1518 = vmatmul.mubr.f32.vlgmr.msra.gmra.mxu1 %v608_v5 }
 0x2c4   : > { %v1519_v20 = vpop.f32.mrf.mxu1 }
 0x2c5   : > { %v704_v23 = vadd.f32 %v1519_v20, %v1324_v19 }
 0x2c6   : > { %v698_v24 = vpop.f32.mrf.mxu1 }
 0x2c7   : > { %v710_v25 = vmul.f32 0.70710677, %v704_v23  ;;  %v699_v26 = vadd.f32 %v1324_v19, %v698_v24  ;;  %v708_v33 = vmul.f32 0.5, %v704_v23  ;;  %v1329_v23 = vld [vmem:[%s2336_s4 + $0x1] ss:$0 sm:$0xff] }
 0x2c9   : > { %1755 = verf.f32 %v710_v25  ;;  %v709_v27 = vmul.f32 0.70710677, %v699_v26  ;;  %v707_v31 = vmul.f32 0.5, %v699_v26  ;;  %v988_v26 = vld [vmem:[#allocation8 + $0xe0] sm:$0xff] }
 0x2cb   : > { %1757 = verf.f32 %v709_v27  ;;  %v987_v27 = vld [vmem:[#allocation8 + $0xd8] sm:$0xff] }
 0x2d6   : > { %v1756_v28 = vpop.eup %1755 }
 0x2d7   : > { %v714_v30 = vadd.f32 1.0, %v1756_v28  ;;  %v986_v28 = vld [vmem:[#allocation8 + $0xd0] sm:$0xff] }
 0x2d8   : > { %v1758_v29 = vpop.eup %1757 }
 0x2d9   : > { %v713_v32 = vadd.f32 1.0, %v1758_v29  ;;  %v716_v35 = vmul.f32 %v714_v30, %v708_v33  ;;  %v985_v29 = vld [vmem:[#allocation8 + $0xc8] sm:$0xff]  ;;  %v984_v30 = vld [vmem:[#allocation8 + $0xc0] sm:$0xff] }
 0x2da   : > { %v981_v33 = vld [vmem:[#allocation8 + $0xa8] sm:$0xff] }
 0x2db   : > { %v715_v34 = vmul.f32 %v713_v32, %v707_v31  ;;  %v983_v31 = vld [vmem:[#allocation8 + $0xb8] sm:$0xff]  ;;  %v982_v32 = vld [vmem:[#allocation8 + $0xb0] sm:$0xff] }
 0x2dd   : > { %1552 = vmatprep.mubr.f32.mxu0 %v715_v34  ;;  %v980_v34 = vld [vmem:[#allocation8 + $0xa0] sm:$0xff] }
 0x2de   : > { %1553 = vmatmul.mubr.f32.vlgmr.msra.gmra.mxu0 %v716_v35  ;;  %v979_v35 = vld [vmem:[#allocation8 + $0x98] sm:$0xff] }
 0x2df   : > { %1591 = vmatpush3.msra.mxu0 %v991_v59 }
 0x2e0   : > { %1592 = vmatprep.subr.mxu0 %v990_v60 }
 0x2e1   : > { %1593 = vmatpush3.msra.mxu0 %v990_v60 }
 0x2e2   : > { %1594 = vmatprep.subr.mxu0 %v989_v61 }
 0x2e3   : > { %1595 = vmatpush3.msra.mxu0 %v989_v61 }
 0x2e4   : > { %1596 = vmatprep.subr.mxu0 %v988_v26 }
 0x2e5   : > { %1597 = vmatpush3.msra.mxu0 %v988_v26 }
 0x2e6   : > { %1598 = vmatprep.subr.mxu0 %v987_v27 }
 0x2e7   : > { %1599 = vmatpush3.msra.mxu0 %v987_v27 }
 0x2e8   : > { %1600 = vmatprep.subr.mxu0 %v986_v28 }
 0x2e9   : > { %1601 = vmatpush3.msra.mxu0 %v986_v28 }
 0x2ea   : > { %1602 = vmatprep.subr.mxu0 %v985_v29 }
 0x2eb   : > { %1603 = vmatpush3.msra.mxu0 %v985_v29 }
 0x2ec   : > { %1604 = vmatprep.subr.mxu0 %v984_v30 }
 0x2ed   : > { %1605 = vmatpush3.msra.mxu0 %v984_v30 }
 0x2ee   : > { %1606 = vmatprep.subr.mxu0 %v983_v31 }
 0x2ef   : > { %1607 = vmatpush3.msra.mxu0 %v983_v31 }
 0x2f0   : > { %1608 = vmatprep.subr.mxu0 %v982_v32 }
 0x2f1   : > { %1609 = vmatpush3.msra.mxu0 %v982_v32 }
 0x2f2   : > { %1610 = vmatprep.subr.mxu0 %v981_v33 }
 0x2f3   : > { %1611 = vmatpush3.msra.mxu0 %v981_v33 }
 0x2f4   : > { %1612 = vmatprep.subr.mxu0 %v980_v34 }
 0x2f5   : > { %1613 = vmatpush3.msra.mxu0 %v980_v34 }
 0x2f6   : > { %1614 = vmatprep.subr.mxu0 %v979_v35 }
 0x2f7   : > { %1615 = vmatpush3.msra.mxu0 %v979_v35 }
 0x39e   : > { %v1554_v36 = vpop.f32.mrf.mxu0 }
 0x39f   : > { %v809_v38 = vadd.f32 %v1554_v36, %v2228_v22  ;;  %v881_v22 = vld [vmem:[#allocation7 + $0xf8] sm:$0xff]  ;;  %v978_v36 = vld [vmem:[#allocation8 + $0x90] sm:$0xff] }
 0x3a0   : > { %v799_v39 = vpop.f32.mrf.mxu0  ;;  %1555 = vmatprep.subr.mxu1 %v881_v22  ;;  %1616 = vmatprep.subr.mxu0 %v978_v36 }
 0x3a1   : > { %v2251_v40 = vadd.f32 %v1325_v37, %v809_v38  ;;  %v808_v41 = vadd.f32 %v799_v39, %v2226_v21  ;;  %1556 = vmatpush3.msra.mxu1 %v881_v22  ;;  %v879_v21 = vld [vmem:[#allocation7 + $0xe8] sm:$0xff]  ;;  %1617 = vmatpush3.msra.mxu0 %v978_v36  ;;  %v976_v38 = vld [vmem:[#allocation8 + $0x80] sm:$0xff]  ;;  %v1094_v39 = vld [vmem:[#allocation10 + $0x78] sm:$0xff] }
 0x3a2   : > { %1557 = vmatprep.subr.mxu1 %v880_v45  ;;  %v1090_v22 = vld [vmem:[#allocation10 + $0x58] sm:$0xff] }
 0x3a3   : > { %v2254_v42 = vadd.f32 %v1325_v37, %v808_v41  ;;  %821 = vadd.xlane.f32.xlu1 %v2251_v40  ;;  %v824_v43 = vmul.f32 %v2251_v40, %v2251_v40  ;;  %1558 = vmatpush3.msra.mxu1 %v880_v45  ;;  %v977_v37 = vld [vmem:[#allocation8 + $0x88] sm:$0xff]  ;;  %v1093_v41 = vld [vmem:[#allocation10 + $0x70] sm:$0xff] }
 0x3a4   : > { %1559 = vmatprep.subr.mxu1 %v879_v21  ;;  %1618 = vmatprep.subr.mxu0 %v977_v37  ;;  %v1089_v45 = vld [vmem:[#allocation10 + $0x50] sm:$0xff] }
 0x3a5   : > { %819 = vadd.xlane.f32.xlu0 %v2254_v42  ;;  %v823_v44 = vmul.f32 %v2254_v42, %v2254_v42  ;;  %1560 = vmatpush3.msra.mxu1 %v879_v21  ;;  %v1088_v21 = vld [vmem:[#allocation10 + $0x48] sm:$0xff] }
 0x3a6   : > { %1561 = vmatprep.subr.mxu1 %v878_v46  ;;  %1619 = vmatpush3.msra.mxu0 %v977_v37 }
 0x3a7   : > { %827 = vadd.xlane.f32.xlu1 %v824_v43  ;;  %1562 = vmatpush3.msra.mxu1 %v878_v46  ;;  %v1092_v43 = vld [vmem:[#allocation10 + $0x68] sm:$0xff]  ;;  %v1087_v46 = vld [vmem:[#allocation10 + $0x40] sm:$0xff] }
 0x3a8   : > { %1563 = vmatprep.subr.mxu1 %v877_v47  ;;  %1620 = vmatprep.subr.mxu0 %v976_v38 }
 0x3a9   : > { %825 = vadd.xlane.f32.xlu0 %v823_v44  ;;  %1564 = vmatpush3.msra.mxu1 %v877_v47  ;;  %v1091_v44 = vld [vmem:[#allocation10 + $0x60] sm:$0xff]  ;;  %v1086_v47 = vld [vmem:[#allocation10 + $0x38] sm:$0xff] }
 0x3aa   : > { %1565 = vmatprep.subr.mxu1 %v876_v48  ;;  %1621 = vmatpush3.msra.mxu0 %v976_v38 }
 0x3ab   : > { %1566 = vmatpush3.msra.mxu1 %v876_v48  ;;  %v1085_v48 = vld [vmem:[#allocation10 + $0x30] sm:$0xff] }
 0x3ac   : > { %1567 = vmatprep.subr.mxu1 %v875_v49 }
 0x3ad   : > { %1568 = vmatpush3.msra.mxu1 %v875_v49  ;;  %v1084_v49 = vld [vmem:[#allocation10 + $0x28] sm:$0xff] }
 0x3ae   : > { %1569 = vmatprep.subr.mxu1 %v874_v50 }
 0x3af   : > { %1570 = vmatpush3.msra.mxu1 %v874_v50  ;;  %v1083_v50 = vld [vmem:[#allocation10 + $0x20] sm:$0xff] }
 0x3b0   : > { %1571 = vmatprep.subr.mxu1 %v873_v51 }
 0x3b1   : > { %1572 = vmatpush3.msra.mxu1 %v873_v51  ;;  %v1331_v51 = vld [vmem:[%s2338_s6 + $0x1] ss:$0 sm:$0xff] }
 0x3b2   : > { %1573 = vmatprep.subr.mxu1 %v872_v52 }
 0x3b3   : > { %1574 = vmatpush3.msra.mxu1 %v872_v52 }
 0x3b4   : > { %1575 = vmatprep.subr.mxu1 %v871_v53 }
 0x3b5   : > { %1576 = vmatpush3.msra.mxu1 %v871_v53 }
 0x3b6   : > { %1577 = vmatprep.subr.mxu1 %v870_v54 }
 0x3b7   : > { %1578 = vmatpush3.msra.mxu1 %v870_v54 }
 0x3b8   : > { %1579 = vmatprep.subr.mxu1 %v869_v55 }
 0x3b9   : > { %1580 = vmatpush3.msra.mxu1 %v869_v55 }
 0x3ba   : > { %1581 = vmatprep.subr.mxu1 %v868_v56 }
 0x3bb   : > { %1582 = vmatpush3.msra.mxu1 %v868_v56 }
 0x3bc   : > { %1583 = vmatprep.subr.mxu1 %v867_v57 }
 0x3bd   : > { %1584 = vmatpush3.msra.mxu1 %v867_v57 }
 0x3be   : > { %1585 = vmatprep.subr.mxu1 %v866_v58 }
 0x3bf   : > { %1586 = vmatpush3.msra.mxu1 %v866_v58 }
 0x3c0   : > { %1625 = vmatprep.subr.mxu1 %v1094_v39 }
 0x42c   : > { %v822_v62 = vpop.xlane.xlu1 %821 }
 0x42d   : > { %v830_v63 = vmul.f32 0.03125, %v822_v62 }
 0x42e   : > { %v820_v0 = vpop.xlane.xlu0 %819 }
 0x42f   : > { %v829_v1 = vmul.f32 0.03125, %v820_v0  ;;  %v834_v3 = vmul.f32 %v830_v63, %v830_v63  ;;  %v838_v12 = vsub.f32 %v2251_v40, %v830_v63 }
 0x430   : > { %v828_v2 = vpop.xlane.xlu1 %827 }
 0x431   : > { %v832_v4 = vmul.f32 0.03125, %v828_v2  ;;  %v833_v6 = vmul.f32 %v829_v1, %v829_v1  ;;  %v837_v14 = vsub.f32 %v2254_v42, %v829_v1  ;;  %v1082_v2 = vld [vmem:[#allocation10 + $0x18] sm:$0xff] }
 0x432   : > { %v826_v5 = vpop.xlane.xlu0 %825 }
 0x433   : > { %v836_v7 = vsub.f32 %v832_v4, %v834_v3  ;;  %v831_v8 = vmul.f32 0.03125, %v826_v5  ;;  %v1081_v3 = vld [vmem:[#allocation10 + $0x10] sm:$0xff]  ;;  %v1080_v4 = vld [vmem:[#allocation10 + $0x8] sm:$0xff]  ;;  %v1079_v5 = vld [vmem:[#allocation10] sm:$0xff] }
 0x435   : > { %v840_v9 = vadd.f32 1e-05, %v836_v7  ;;  %v835_v10 = vsub.f32 %v831_v8, %v833_v6 }
 0x437   : > { %1759 = vrsqrt.f32 %v840_v9  ;;  %v839_v11 = vadd.f32 1e-05, %v835_v10  ;;  %v1333_v9 = vld [vmem:[%s2340_s8 + $0x1] ss:$0 sm:$0xff] }
 0x439   : > { %1761 = vrsqrt.f32 %v839_v11 }
 0x444   : > { %v1760_v13 = vpop.eup %1759 }
 0x445   : > { %v844_v15 = vmul.f32 %v1760_v13, %v838_v12  ;;  %v1334_v13 = vld [vmem:[%s2342_s10] ss:$0 sm:$0xff] }
 0x446   : > { %v1762_v17 = vpop.eup %1761 }
 0x447   : > { %v843_v18 = vmul.f32 %v1762_v17, %v837_v14  ;;  %v854_v19 = vmul.f32 %v1327_v16, %v844_v15 }
 0x449   : > { %v853_v20 = vmul.f32 %v1327_v16, %v843_v18  ;;  %v864_v25 = vadd.f32 %v1329_v23, %v854_v19 }
 0x44b   : > { %v863_v24 = vadd.f32 %v1329_v23, %v853_v20 }
 0x44d   : > { %1587 = vmatprep.mubr.f32.mxu1 %v863_v24 }
 0x44e   : > { %1588 = vmatmul.mubr.f32.vlgmr.msra.gmra.mxu1 %v864_v25 }
 0x44f   : > { %1626 = vmatpush3.msra.mxu1 %v1094_v39 }
 0x450   : > { %1627 = vmatprep.subr.mxu1 %v1093_v41 }
 0x451   : > { %1628 = vmatpush3.msra.mxu1 %v1093_v41 }
 0x452   : > { %1629 = vmatprep.subr.mxu1 %v1092_v43 }
 0x453   : > { %1630 = vmatpush3.msra.mxu1 %v1092_v43 }
 0x454   : > { %1631 = vmatprep.subr.mxu1 %v1091_v44 }
 0x455   : > { %1632 = vmatpush3.msra.mxu1 %v1091_v44 }
 0x456   : > { %1633 = vmatprep.subr.mxu1 %v1090_v22 }
 0x457   : > { %1634 = vmatpush3.msra.mxu1 %v1090_v22 }
 0x458   : > { %1635 = vmatprep.subr.mxu1 %v1089_v45 }
 0x459   : > { %1636 = vmatpush3.msra.mxu1 %v1089_v45 }
 0x45a   : > { %1637 = vmatprep.subr.mxu1 %v1088_v21 }
 0x45b   : > { %1638 = vmatpush3.msra.mxu1 %v1088_v21 }
 0x45c   : > { %1639 = vmatprep.subr.mxu1 %v1087_v46 }
 0x45d   : > { %1640 = vmatpush3.msra.mxu1 %v1087_v46 }
 0x45e   : > { %1641 = vmatprep.subr.mxu1 %v1086_v47 }
 0x45f   : > { %1642 = vmatpush3.msra.mxu1 %v1086_v47 }
 0x460   : > { %1643 = vmatprep.subr.mxu1 %v1085_v48 }
 0x461   : > { %1644 = vmatpush3.msra.mxu1 %v1085_v48 }
 0x462   : > { %1645 = vmatprep.subr.mxu1 %v1084_v49 }
 0x463   : > { %1646 = vmatpush3.msra.mxu1 %v1084_v49 }
 0x464   : > { %1647 = vmatprep.subr.mxu1 %v1083_v50 }
 0x465   : > { %1648 = vmatpush3.msra.mxu1 %v1083_v50 }
 0x466   : > { %1649 = vmatprep.subr.mxu1 %v1082_v2 }
 0x467   : > { %1650 = vmatpush3.msra.mxu1 %v1082_v2 }
 0x468   : > { %1651 = vmatprep.subr.mxu1 %v1081_v3 }
 0x469   : > { %1652 = vmatpush3.msra.mxu1 %v1081_v3 }
 0x46a   : > { %1653 = vmatprep.subr.mxu1 %v1080_v4 }
 0x46b   : > { %1654 = vmatpush3.msra.mxu1 %v1080_v4 }
 0x46c   : > { %1655 = vmatprep.subr.mxu1 %v1079_v5 }
 0x46d   : > { %1656 = vmatpush3.msra.mxu1 %v1079_v5 }
 0x50e   : > { %v1589_v52 = vpop.f32.mrf.mxu1 }
 0x50f   : > { %v962_v53 = vadd.f32 %v1589_v52, %v1331_v51 }
 0x510   : > { %v956_v54 = vpop.f32.mrf.mxu1 }
 0x511   : > { %v968_v55 = vmul.f32 0.70710677, %v962_v53  ;;  %v957_v56 = vadd.f32 %v1331_v51, %v956_v54  ;;  %v966_v63 = vmul.f32 0.5, %v962_v53 }
 0x513   : > { %1763 = verf.f32 %v968_v55  ;;  %v967_v57 = vmul.f32 0.70710677, %v957_v56  ;;  %v965_v61 = vmul.f32 0.5, %v957_v56 }
 0x515   : > { %1765 = verf.f32 %v967_v57 }
 0x520   : > { %v1764_v58 = vpop.eup %1763 }
 0x521   : > { %v972_v60 = vadd.f32 1.0, %v1764_v58 }
 0x522   : > { %v1766_v59 = vpop.eup %1765 }
 0x523   : > { %v971_v62 = vadd.f32 1.0, %v1766_v59  ;;  %v974_v1 = vmul.f32 %v972_v60, %v966_v63 }
 0x525   : > { %v973_v0 = vmul.f32 %v971_v62, %v965_v61 }
 0x527   : > { %1622 = vmatprep.mubr.f32.mxu0 %v973_v0 }
 0x528   : > { %1623 = vmatmul.mubr.f32.vlgmr.msra.gmra.mxu0 %v974_v1 }
 0x5e8   : > { %v1624_v6 = vpop.f32.mrf.mxu0 }
 0x5e9   : > { %v1068_v7 = vadd.f32 %v1624_v6, %v2251_v40 }
 0x5ea   : > { %v1058_v8 = vpop.f32.mrf.mxu0 }
 0x5eb   : > { %v1067_v10 = vadd.f32 %v1058_v8, %v2254_v42  ;;  %v1078_v12 = vadd.f32 %v1333_v9, %v1068_v7 }
 0x5ed   : > { %v1077_v11 = vadd.f32 %v1333_v9, %v1067_v10 }
 0x5ef   : > { %1657 = vmatprep.mubr.f32.mxu1 %v1077_v11 }
 0x5f0   : > { %1658 = vmatmul.mubr.f32.vlgmr.msra.gmra.mxu1 %v1078_v12 }
 0x6b0   : > { %v1659_v40 = vpop.f32.mrf.mxu1 }
 0x6b1   : > { %v1174_v14 = vadd.f32 %v1659_v40, %v1334_v13 }
 0x6b2   : > { %v1168_v42 = vpop.f32.mrf.mxu1 }
 0x6b3   : > { %1178 = vst [vmem:[%s462_s12 + $0x8] sm:$0xff] %v1174_v14  ;;  %v1169_v15 = vadd.f32 %v1334_v13, %v1168_v42 }
 0x6b5   : > { %1177 = vst [vmem:[%s462_s12] sm:$0xff] %v1169_v15 }
 0x6b6   : > { %1912 = shalt.err (!%p1909_p5)
}
 0x6b7   : > { %s1913_s16 = scalar_lea.hbm %s2289_s5, 256  ;;  %s1917_s22 = scalar_lea.hbm %s2343_s11, 512 }
 0x6b8   : > { %p1914_p6 = scmp.ne.s32.totalorder %s2289_s5, %s1913_s16  ;;  %p1918_p9 = scmp.lt.s32.totalorder %s2289_s5, %s2343_s11 }
 0x6b9   : > { %p1919_p2 = scmp.lt.s32.totalorder %s1917_s22, %s1913_s16 }
 0x6ba   : > { %p1915_p4 = pnand %p1914_p6, %p2373_p12 }
 0x6bb   : > { %p1920_p3 = por %p1919_p2, %p1918_p9 }
 0x6bc   : > { %p1916_p8 = pneg %p1915_p4 }
 0x6be   : > { %p1921_p10 = pnand %p1920_p3, %p1916_p8 }
 0x6c0   : > { %1924 = shalt.err (!%p1921_p10)
}
 0x6c1   : > { %s1981_s29 = smov 128   ;;  %s1982_s13 = smov 8  }
 0x6c2   : > { %1678 = dma.vmem_to_hbm [thread:$0]  (%p2373_p12), %s2284_s15, 256, %s2289_s5, %s1180_s1, %s1981_s29, %s1981_s29, %s1982_s13  }
 0x6c3 PF: > { %s1208_s30 = sand.u32 1, %s1959_s17   ;;  %p2374_p7 = scmp.ne.s32.totalorder %s2355_s24, 0 }
 0x6c4   : > { %p2375_p1 = scmp.ge.s32.totalorder %s1971_s20, 2  ;;  %s1209_s21 = scalar_lea.sflag [#allocation4], %s1208_s30 }
 0x6c6   : > { %p1698_p13 = pnand %p2375_p1, %p2374_p7 }
 0x6c8   : > { %p1699_p0 = pneg %p1698_p13 }
 0x6ca   : > { %1954 = dma.done.wait (%p1699_p0), %s1209_s21, 256  }
 0x6cb   : > { %1956 = vsyncadd (%p1699_p0), %s1209_s21, 4294967040  ;;  %s2376_s23 = sld [smem:[#allocation16_spill]]  ;;  %p26_p11 = scmp.ge.s32.totalorder %s2143_s27, 4  }
 0x6cc   : > { %s2377_s17 = smov %s1963_s18  ;;  %s2378_s18 = smov %s1967_s19 }
 0x6cd   : > { %s2380_s20 = smov %s2143_s27  ;;  %28 = sbr.rel (!%p26_p11) target bundleno = 12 (0xc), region = 131 }
 0x6d1   : > { %s2379_s19 = smov %s2376_s23 }
 0x6d2   :  { %1214 = vsyncpa [#allocation3], 1 }
 0x6d3   :  { %1216 = vsyncpa [#allocation3 + $0x1], 1 }
 0x6d4   :  { %1217 = vsyncpa [#allocation6], 1 }
 0x6d5   :  { %1218 = vsyncpa [#allocation9], 1 }
 0x6d6   :  { %1219 = vsyncpa [#allocation4], 1 }
 0x6d7   :  { %1221 = vsyncpa [#allocation4 + $0x1], 1 }

</bundles_post_ra>
